<compile_context>
chip_gen: v5e
topology: v5e:2x2
jax: 0.10.0
libtpu: 0.0.40
codegen_flags: <defaults>
</compile_context>

<pallas_src>
import functools

import jax
import jax.numpy as jnp
from jax.experimental import pallas as pl
from jax.experimental.pallas import tpu as pltpu

H1, H2, H3 = 500, 100, 30  # hidden sizes from the PyTorch module


def _round_up(n, m):
    return ((n + m - 1) // m) * m


def _pad2(a, rows, cols):
    r, c = a.shape
    return jnp.pad(a, ((0, rows - r), (0, cols - c)))


def _sigmoid(h):
    # sigmoid(h) == 0.5 * tanh(0.5 * h) + 0.5 exactly; tanh is an EUP
    # transcendental (separate issue slot), avoiding a VALU f32 divide.
    return 0.5 * jnp.tanh(0.5 * h) + 0.5


def _mlp_kernel(x_ref,
                w1_ref, b1_ref,
                w2_ref, b2_ref,
                w3_ref, b3_ref,
                w4_ref, b4_ref,
                o_ref):
    # x arrives as f32 (tb, in_features); one VPU cast to the bf16 MXU operand.
    x = x_ref[...].astype(jnp.bfloat16)
    # fc1 -> sigmoid (bf16 operands, f32 MXU accumulation; activation in f32)
    h = jnp.dot(x, w1_ref[...], preferred_element_type=jnp.float32)
    h = _sigmoid(h + b1_ref[...])
    # fc2 -> sigmoid
    h = jnp.dot(h.astype(jnp.bfloat16), w2_ref[...],
                preferred_element_type=jnp.float32)
    h = _sigmoid(h + b2_ref[...])
    # fc3 -> sigmoid
    h = jnp.dot(h.astype(jnp.bfloat16), w3_ref[...],
                preferred_element_type=jnp.float32)
    h = _sigmoid(h + b3_ref[...])
    # fc4 (no activation, matches PyTorch forward)
    out = jnp.dot(h.astype(jnp.bfloat16), w4_ref[...],
                  preferred_element_type=jnp.float32)
    o_ref[...] = (out + b4_ref[...]).astype(o_ref.dtype)


def prepare_params(params):
    """Pad + cast weights/biases once (call OUTSIDE the serving loop / jit)."""
    in_features = params["w1"].shape[0]
    num_classes = params["w4"].shape[1]
    h1_p = _round_up(H1, 128)            # 512
    h2_p = _round_up(H2, 128)            # 128
    h3_p = _round_up(H3, 128)            # 128
    out_p = _round_up(num_classes, 128)  # 128
    prepared = {
        # w1: contraction dim stays at in_features (MXU handles any K);
        # only the output dim is lane-padded.
        "w1": _pad2(params["w1"], in_features, h1_p).astype(jnp.bfloat16),
        "w2": _pad2(params["w2"], h1_p, h2_p).astype(jnp.bfloat16),
        "w3": _pad2(params["w3"], h2_p, h3_p).astype(jnp.bfloat16),
        "w4": _pad2(params["w4"], h3_p, out_p).astype(jnp.bfloat16),
        "b1": _pad2(params["b1"], 1, h1_p),
        "b2": _pad2(params["b2"], 1, h2_p),
        "b3": _pad2(params["b3"], 1, h3_p),
        "b4": _pad2(params["b4"], 1, out_p),
    }
    return prepared, num_classes


def _choose_batch_tile(B_p, tb_max):
    """Largest 128-multiple tile dividing B_p, capped at tb_max, with >= 2 grid
    steps whenever the padded batch allows (lets v7x shard across its 2 TCs)."""
    min_steps = 2 if B_p >= 256 else 1
    tb = 128
    t = 128
    while t <= min(tb_max, B_p):
        if B_p % t == 0 and B_p // t >= min_steps:
            tb = t
        t += 128
    return tb


@functools.partial(jax.jit, static_argnames=("num_classes", "tb_max"))
def red_neuronal3_sigm_forward(x, prepared, num_classes, tb_max=2048):
    """x: (B, input_size) float32. prepared: output of prepare_params."""
    B, in_features = x.shape
    h1_p = prepared["w1"].shape[1]
    h2_p = prepared["w2"].shape[1]
    h3_p = prepared["w3"].shape[1]
    out_p = prepared["w4"].shape[1]

    # Batch padded only to the next multiple of 128 (<= 127 wasted rows), f32,
    # feature dim untouched (no padded bf16 copy of x in HBM).
    B_p = _round_up(B, 128)
    tb = _choose_batch_tile(B_p, tb_max)
    xp = jnp.pad(x, ((0, B_p - B), (0, 0)))

    def resident(shape):  # full-array block, constant index_map -> VMEM-resident
        return pl.BlockSpec(shape, lambda i: (0, 0))

    out = pl.pallas_call(
        _mlp_kernel,
        out_shape=jax.ShapeDtypeStruct((B_p, out_p), jnp.float32),
        grid=(B_p // tb,),
        in_specs=[
            # x streams over the batch; last dim == full array dim (legal, unpadded).
            pl.BlockSpec((tb, in_features), lambda i: (i, 0)),
            resident((in_features, h1_p)), resident((1, h1_p)),
            resident((h1_p, h2_p)), resident((1, h2_p)),
            resident((h2_p, h3_p)), resident((1, h3_p)),
            resident((h3_p, out_p)), resident((1, out_p)),
        ],
        out_specs=pl.BlockSpec((tb, out_p), lambda i: (i, 0)),
        compiler_params=pltpu.CompilerParams(
            dimension_semantics=("parallel",)),
    )(xp, prepared["w1"], prepared["b1"], prepared["w2"], prepared["b2"],
      prepared["w3"], prepared["b3"], prepared["w4"], prepared["b4"])

    return out[:B, :num_classes]


def init_params(key, input_size, num_classes):
    """Deterministic synthetic init (PyTorch-like uniform fan-in scaling)."""
    sizes = [(input_size, H1), (H1, H2), (H2, H3), (H3, num_classes)]
    params = {}
    keys = jax.random.split(key, 2 * len(sizes))
    for i, (fan_in, fan_out) in enumerate(sizes):
        bound = 1.0 / jnp.sqrt(jnp.float32(fan_in))
        w = jax.random.uniform(keys[2 * i], (fan_in, fan_out),
                               minval=-bound, maxval=bound, dtype=jnp.float32)
        b = jax.random.uniform(keys[2 * i + 1], (1, fan_out),
                               minval=-bound, maxval=bound, dtype=jnp.float32)
        params[f"w{i + 1}"] = w
        params[f"b{i + 1}"] = b
    return params


def reference_forward(x, p):
    h = jax.nn.sigmoid(x @ p["w1"] + p["b1"])
    h = jax.nn.sigmoid(h @ p["w2"] + p["b2"])
    h = jax.nn.sigmoid(h @ p["w3"] + p["b3"])
    return h @ p["w4"] + p["b4"]


if __name__ == "__main__":
    input_size = 64
    num_classes = 10

    key = jax.random.PRNGKey(0)
    k_x1, k_x2, k_p = jax.random.split(key, 3)
    params = init_params(k_p, input_size, num_classes)
    prepared, nc = prepare_params(params)  # pad/cast weights once, outside jit

    # Small batch (single grid step).
    x1 = jax.random.normal(k_x1, (8, input_size), dtype=jnp.float32)
    out1 = jax.block_until_ready(red_neuronal3_sigm_forward(x1, prepared, nc))
    ref1 = reference_forward(x1, params)
    assert out1.shape == (8, num_classes)
    # bf16 operands / f32 accumulation -> relaxed tolerance vs f32 reference.
    assert jnp.allclose(out1, ref1, atol=1e-2, rtol=1e-2)

    # Non-multiple-of-128 batch (exercises 128-padding + multi-step parallel grid).
    x2 = jax.random.normal(k_x2, (300, input_size), dtype=jnp.float32)
    out2 = jax.block_until_ready(red_neuronal3_sigm_forward(x2, prepared, nc))
    ref2 = reference_forward(x2, params)
    assert out2.shape == (300, num_classes)
    assert jnp.allclose(out2, ref2, atol=1e-2, rtol=1e-2)

    print("KERNEL_OK")
</pallas_src>

<mosaic_0001>
module attributes {stable_mosaic.version = 11 : i64} {
  func.func @_mlp_kernel(%arg0: i32, %arg1: memref<128x64xf32, #tpu.memory_space<vmem>>, %arg2: memref<64x512xbf16, #tpu.memory_space<vmem>>, %arg3: memref<1x512xf32, #tpu.memory_space<vmem>>, %arg4: memref<512x128xbf16, #tpu.memory_space<vmem>>, %arg5: memref<1x128xf32, #tpu.memory_space<vmem>>, %arg6: memref<128x128xbf16, #tpu.memory_space<vmem>>, %arg7: memref<1x128xf32, #tpu.memory_space<vmem>>, %arg8: memref<128x128xbf16, #tpu.memory_space<vmem>>, %arg9: memref<1x128xf32, #tpu.memory_space<vmem>>, %arg10: memref<128x128xf32, #tpu.memory_space<vmem>>) attributes {dimension_semantics = [#tpu.dimension_semantics<parallel>], iteration_bounds = array<i64: 1>, scalar_prefetch = 0 : i64, scratch_operands = 0 : i64, tpu.core_type = #tpu.core_type<tc>, window_params = [{transform_indices = @transform_0, window_bounds = array<i64: 128, 64>}, {pipeline_mode = #tpu.pipeline_mode<synchronous>, transform_indices = @transform_1, window_bounds = array<i64: 64, 512>}, {pipeline_mode = #tpu.pipeline_mode<synchronous>, transform_indices = @transform_2, window_bounds = array<i64: 1, 512>}, {pipeline_mode = #tpu.pipeline_mode<synchronous>, transform_indices = @transform_3, window_bounds = array<i64: 512, 128>}, {pipeline_mode = #tpu.pipeline_mode<synchronous>, transform_indices = @transform_4, window_bounds = array<i64: 1, 128>}, {pipeline_mode = #tpu.pipeline_mode<synchronous>, transform_indices = @transform_5, window_bounds = array<i64: 128, 128>}, {pipeline_mode = #tpu.pipeline_mode<synchronous>, transform_indices = @transform_6, window_bounds = array<i64: 1, 128>}, {pipeline_mode = #tpu.pipeline_mode<synchronous>, transform_indices = @transform_7, window_bounds = array<i64: 128, 128>}, {pipeline_mode = #tpu.pipeline_mode<synchronous>, transform_indices = @transform_8, window_bounds = array<i64: 1, 128>}, {transform_indices = @transform_9, window_bounds = array<i64: 128, 128>}]} {
    %c0 = arith.constant 0 : index
    %c0_0 = arith.constant 0 : index
    %0 = vector.load %arg1[%c0, %c0_0] : memref<128x64xf32, #tpu.memory_space<vmem>>, vector<128x64xf32>
    %1 = arith.truncf %0 : vector<128x64xf32> to vector<128x64xbf16>
    %c0_1 = arith.constant 0 : index
    %c0_2 = arith.constant 0 : index
    %2 = vector.load %arg2[%c0_1, %c0_2] : memref<64x512xbf16, #tpu.memory_space<vmem>>, vector<64x512xbf16>
    %cst = arith.constant dense<0.000000e+00> : vector<128x512xf32>
    %3 = tpu.matmul %1, %2, %cst {dimension_numbers = #tpu.dot_dimension_numbers<[1], [0], [0], [1], [0, 0, 1, 1], [], []>} : vector<128x64xbf16>, vector<64x512xbf16>, vector<128x512xf32> -> vector<128x512xf32>
    %c0_3 = arith.constant 0 : index
    %c0_4 = arith.constant 0 : index
    %4 = vector.load %arg3[%c0_3, %c0_4] : memref<1x512xf32, #tpu.memory_space<vmem>>, vector<1x512xf32>
    %5 = vector.broadcast %4 : vector<1x512xf32> to vector<128x512xf32>
    %6 = arith.addf %3, %5 : vector<128x512xf32>
    %cst_5 = arith.constant 5.000000e-01 : f32
    %7 = vector.broadcast %cst_5 : f32 to vector<128x512xf32>
    %8 = arith.mulf %7, %6 : vector<128x512xf32>
    %9 = math.tanh %8 : vector<128x512xf32>
    %cst_6 = arith.constant 5.000000e-01 : f32
    %10 = vector.broadcast %cst_6 : f32 to vector<128x512xf32>
    %11 = arith.mulf %10, %9 : vector<128x512xf32>
    %cst_7 = arith.constant 5.000000e-01 : f32
    %12 = vector.broadcast %cst_7 : f32 to vector<128x512xf32>
    %13 = arith.addf %11, %12 : vector<128x512xf32>
    %14 = arith.truncf %13 : vector<128x512xf32> to vector<128x512xbf16>
    %c0_8 = arith.constant 0 : index
    %c0_9 = arith.constant 0 : index
    %15 = vector.load %arg4[%c0_8, %c0_9] : memref<512x128xbf16, #tpu.memory_space<vmem>>, vector<512x128xbf16>
    %cst_10 = arith.constant dense<0.000000e+00> : vector<128x128xf32>
    %16 = tpu.matmul %14, %15, %cst_10 {dimension_numbers = #tpu.dot_dimension_numbers<[1], [0], [0], [1], [0, 0, 1, 1], [], []>} : vector<128x512xbf16>, vector<512x128xbf16>, vector<128x128xf32> -> vector<128x128xf32>
    %c0_11 = arith.constant 0 : index
    %c0_12 = arith.constant 0 : index
    %17 = vector.load %arg5[%c0_11, %c0_12] : memref<1x128xf32, #tpu.memory_space<vmem>>, vector<1x128xf32>
    %18 = vector.broadcast %17 : vector<1x128xf32> to vector<128x128xf32>
    %19 = arith.addf %16, %18 : vector<128x128xf32>
    %cst_13 = arith.constant 5.000000e-01 : f32
    %20 = vector.broadcast %cst_13 : f32 to vector<128x128xf32>
    %21 = arith.mulf %20, %19 : vector<128x128xf32>
    %22 = math.tanh %21 : vector<128x128xf32>
    %cst_14 = arith.constant 5.000000e-01 : f32
    %23 = vector.broadcast %cst_14 : f32 to vector<128x128xf32>
    %24 = arith.mulf %23, %22 : vector<128x128xf32>
    %cst_15 = arith.constant 5.000000e-01 : f32
    %25 = vector.broadcast %cst_15 : f32 to vector<128x128xf32>
    %26 = arith.addf %24, %25 : vector<128x128xf32>
    %27 = arith.truncf %26 : vector<128x128xf32> to vector<128x128xbf16>
    %c0_16 = arith.constant 0 : index
    %c0_17 = arith.constant 0 : index
    %28 = vector.load %arg6[%c0_16, %c0_17] : memref<128x128xbf16, #tpu.memory_space<vmem>>, vector<128x128xbf16>
    %cst_18 = arith.constant dense<0.000000e+00> : vector<128x128xf32>
    %29 = tpu.matmul %27, %28, %cst_18 {dimension_numbers = #tpu.dot_dimension_numbers<[1], [0], [0], [1], [0, 0, 1, 1], [], []>} : vector<128x128xbf16>, vector<128x128xbf16>, vector<128x128xf32> -> vector<128x128xf32>
    %c0_19 = arith.constant 0 : index
    %c0_20 = arith.constant 0 : index
    %30 = vector.load %arg7[%c0_19, %c0_20] : memref<1x128xf32, #tpu.memory_space<vmem>>, vector<1x128xf32>
    %31 = vector.broadcast %30 : vector<1x128xf32> to vector<128x128xf32>
    %32 = arith.addf %29, %31 : vector<128x128xf32>
    %cst_21 = arith.constant 5.000000e-01 : f32
    %33 = vector.broadcast %cst_21 : f32 to vector<128x128xf32>
    %34 = arith.mulf %33, %32 : vector<128x128xf32>
    %35 = math.tanh %34 : vector<128x128xf32>
    %cst_22 = arith.constant 5.000000e-01 : f32
    %36 = vector.broadcast %cst_22 : f32 to vector<128x128xf32>
    %37 = arith.mulf %36, %35 : vector<128x128xf32>
    %cst_23 = arith.constant 5.000000e-01 : f32
    %38 = vector.broadcast %cst_23 : f32 to vector<128x128xf32>
    %39 = arith.addf %37, %38 : vector<128x128xf32>
    %40 = arith.truncf %39 : vector<128x128xf32> to vector<128x128xbf16>
    %c0_24 = arith.constant 0 : index
    %c0_25 = arith.constant 0 : index
    %41 = vector.load %arg8[%c0_24, %c0_25] : memref<128x128xbf16, #tpu.memory_space<vmem>>, vector<128x128xbf16>
    %cst_26 = arith.constant dense<0.000000e+00> : vector<128x128xf32>
    %42 = tpu.matmul %40, %41, %cst_26 {dimension_numbers = #tpu.dot_dimension_numbers<[1], [0], [0], [1], [0, 0, 1, 1], [], []>} : vector<128x128xbf16>, vector<128x128xbf16>, vector<128x128xf32> -> vector<128x128xf32>
    %c0_27 = arith.constant 0 : index
    %c0_28 = arith.constant 0 : index
    %43 = vector.load %arg9[%c0_27, %c0_28] : memref<1x128xf32, #tpu.memory_space<vmem>>, vector<1x128xf32>
    %44 = vector.broadcast %43 : vector<1x128xf32> to vector<128x128xf32>
    %45 = arith.addf %42, %44 : vector<128x128xf32>
    %c0_29 = arith.constant 0 : index
    %c0_30 = arith.constant 0 : index
    %46 = vector.load %arg10[%c0_29, %c0_30] : memref<128x128xf32, #tpu.memory_space<vmem>>, vector<128x128xf32>
    tpu.vector_store %arg10[%c0_29, %c0_30], %45 {strides = array<i32>} : memref<128x128xf32, #tpu.memory_space<vmem>>, vector<128x128xf32>,
    return
  }
  func.func @transform_0(%arg0: i32) -> (i32, i32) {
    %c0_i32 = arith.constant 0 : i32
    %c0_i32_0 = arith.constant 0 : i32
    return %arg0, %c0_i32 : i32, i32
  }
  func.func @transform_1(%arg0: i32) -> (i32, i32) {
    %c0_i32 = arith.constant 0 : i32
    %c0_i32_0 = arith.constant 0 : i32
    %c0_i32_1 = arith.constant 0 : i32
    return %c0_i32, %c0_i32_0 : i32, i32
  }
  func.func @transform_2(%arg0: i32) -> (i32, i32) {
    %c0_i32 = arith.constant 0 : i32
    %c0_i32_0 = arith.constant 0 : i32
    %c0_i32_1 = arith.constant 0 : i32
    return %c0_i32, %c0_i32_0 : i32, i32
  }
  func.func @transform_3(%arg0: i32) -> (i32, i32) {
    %c0_i32 = arith.constant 0 : i32
    %c0_i32_0 = arith.constant 0 : i32
    %c0_i32_1 = arith.constant 0 : i32
    return %c0_i32, %c0_i32_0 : i32, i32
  }
  func.func @transform_4(%arg0: i32) -> (i32, i32) {
    %c0_i32 = arith.constant 0 : i32
    %c0_i32_0 = arith.constant 0 : i32
    %c0_i32_1 = arith.constant 0 : i32
    return %c0_i32, %c0_i32_0 : i32, i32
  }
  func.func @transform_5(%arg0: i32) -> (i32, i32) {
    %c0_i32 = arith.constant 0 : i32
    %c0_i32_0 = arith.constant 0 : i32
    %c0_i32_1 = arith.constant 0 : i32
    return %c0_i32, %c0_i32_0 : i32, i32
  }
  func.func @transform_6(%arg0: i32) -> (i32, i32) {
    %c0_i32 = arith.constant 0 : i32
    %c0_i32_0 = arith.constant 0 : i32
    %c0_i32_1 = arith.constant 0 : i32
    return %c0_i32, %c0_i32_0 : i32, i32
  }
  func.func @transform_7(%arg0: i32) -> (i32, i32) {
    %c0_i32 = arith.constant 0 : i32
    %c0_i32_0 = arith.constant 0 : i32
    %c0_i32_1 = arith.constant 0 : i32
    return %c0_i32, %c0_i32_0 : i32, i32
  }
  func.func @transform_8(%arg0: i32) -> (i32, i32) {
    %c0_i32 = arith.constant 0 : i32
    %c0_i32_0 = arith.constant 0 : i32
    %c0_i32_1 = arith.constant 0 : i32
    return %c0_i32, %c0_i32_0 : i32, i32
  }
  func.func @transform_9(%arg0: i32) -> (i32, i32) {
    %c0_i32 = arith.constant 0 : i32
    %c0_i32_0 = arith.constant 0 : i32
    return %arg0, %c0_i32 : i32, i32
  }
}

</mosaic_0001>

<bundles_post_ra>
// kernel: red_neuronal3_sigm_forward.1
= control target key start
LH: loop header
LB: loop body
LE: loop exit
PB: predicated region body
PF: predicated region fallthrough
CT: control target
= control target key end

     0   :  { %14 = vsyncpa [#allocation3], 0  ;;  %s2727_s0 = inlined_call_operand.vmem [shape: f32[128,64], index: 0, kind: input, shape index: {}]   ;;  %s2728_s1 = inlined_call_operand.vmem [shape: bf16[64,512], index: 1, kind: input, shape index: {}]   ;;  %s2729_s2 = inlined_call_operand.vmem [shape: f32[1,512], index: 2, kind: input, shape index: {}]   ;;  %s2730_s3 = inlined_call_operand.hbm [shape: bf16[512,128], index: 3, kind: input, shape index: {}]   ;;  %s2731_s4 = inlined_call_operand.vmem [shape: f32[1,128], index: 4, kind: input, shape index: {}]   ;;  %s2732_s5 = inlined_call_operand.hbm [shape: bf16[128,128], index: 5, kind: input, shape index: {}]   ;;  %s2733_s6 = inlined_call_operand.vmem [shape: f32[1,128], index: 6, kind: input, shape index: {}]   ;;  %s2734_s7 = inlined_call_operand.hbm [shape: bf16[128,128], index: 7, kind: input, shape index: {}]   ;;  %s2735_s8 = inlined_call_operand.vmem [shape: f32[1,128], index: 8, kind: input, shape index: {}]   ;;  %s2736_s9 = inlined_call_operand.vmem [shape: f32[128,128], index: 9, kind: output, shape index: {}]  }
   0x1   :  { %15 = vsyncpa [#allocation5], 0  ;;  %s41_s11 = sshll.u32 %s2732_s5, 4  ;;  %s2211_s12 = smov [#allocation4]   ;;  %s42_s11 = int_to_ptr.hbm [resolvable:$true] %s41_s11 }
   0x2   :  { %s43_s13 = sshll.u32 %s2211_s12, 4  ;;  %s26_s16 = sshll.u32 %s2730_s3, 4  ;;  %s44_s13 = int_to_ptr.vmem [resolvable:$true] %s43_s13  ;;  %s27_s16 = int_to_ptr.hbm [resolvable:$true] %s26_s16 }
   0x3   :  { %s2212_s17 = smov 64   ;;  %s2213_s18 = smov 4  }
   0x4   :  { %49 = dma.hbm_to_vmem [thread:$0]  %s42_s11, 1024, %s44_s13, [#allocation5], %s2212_s17, %s2212_s17, %s2213_s18  }
   0x5   :  { %s2214_s19 = smov [#allocation2]   ;;  %s56_s23 = sshll.u32 %s2734_s7, 4  ;;  %s57_s23 = int_to_ptr.hbm [resolvable:$true] %s56_s23 }
   0x6   :  { %s28_s20 = sshll.u32 %s2214_s19, 4  ;;  %s2215_s5 = smov [#allocation6]   ;;  %s29_s20 = int_to_ptr.vmem [resolvable:$true] %s28_s20 }
   0x7   :  { %34 = dma.hbm_to_vmem [thread:$0]  %s27_s16, 4096, %s29_s20, [#allocation3], %s2212_s17, %s2212_s17, %s2213_s18  }
   0x8   :  { %s58_s24 = sshll.u32 %s2215_s5, 4  ;;  %s59_s24 = int_to_ptr.vmem [resolvable:$true] %s58_s24 }
   0x9   :  { %64 = dma.hbm_to_vmem [thread:$0]  %s57_s23, 1024, %s59_s24, [#allocation5], %s2212_s17, %s2212_s17, %s2213_s18  }
   0xa   :  { %2207 = dma.done.wait [#allocation3], 4096  }
   0xb   :  { %2208 = vsyncadd [#allocation3], 4294963200 }
   0xc   :  { %2209 = dma.done.wait [#allocation5], 2048  }
   0xd   :  { %2210 = vsyncadd [#allocation5], 4294965248  ;;  %v1625_v0 = vld [vmem:[%s2728_s1 + $0x60] sm:$0xf]  ;;  %v1877_v1 = vld [vmem:[%s2728_s1 + $0x6c] sm:$0xf0] }
   0xe   :  { %v1875_v2 = vld [vmem:[%s2728_s1 + $0x64] sm:$0xf]  ;;  %v1626_v3 = vor.u32 %v1877_v1, %v1625_v0  ;;  %v1627_v4 = vld [vmem:[%s2728_s1 + $0x70] sm:$0xf0]  ;;  %v1609_v5 = vld [vmem:[%s2728_s1 + $0x40] sm:$0xf] }
   0xf   :  { %v1873_v6 = vld [vmem:[%s2728_s1 + $0x4c] sm:$0xf0]  ;;  %v1630_v7 = vor.u32 %v1875_v2, %v1627_v4  ;;  %v1871_v8 = vld [vmem:[%s2728_s1 + $0x44] sm:$0xf]  ;;  %v1611_v9 = vld [vmem:[%s2728_s1 + $0x50] sm:$0xf0] }
  0x10   :  { %239 = vmatpush.bf16.msra.mxu0 %v1626_v3  ;;  %1927 = vmatpush.bf16.msra.mxu2 %v1626_v3  ;;  %v1610_v10 = vor.u32 %v1873_v6, %v1609_v5  ;;  %v1614_v11 = vor.u32 %v1871_v8, %v1611_v9  ;;  %v1593_v12 = vld [vmem:[%s2728_s1 + $0x20] sm:$0xf]  ;;  %v1869_v13 = vld [vmem:[%s2728_s1 + $0x2c] sm:$0xf0]  ;;  %v1867_v14 = vld [vmem:[%s2728_s1 + $0x24] sm:$0xf] }
  0x11   :  { %288 = vmatpush.bf16.msra.mxu1 %v1630_v7  ;;  %1931 = vmatpush.bf16.msra.mxu3 %v1630_v7  ;;  %v1595_v15 = vld [vmem:[%s2728_s1 + $0x30] sm:$0xf0]  ;;  %v1594_v16 = vor.u32 %v1869_v13, %v1593_v12  ;;  %v1577_v17 = vld [vmem:[%s2728_s1] sm:$0xf]  ;;  %v1865_v19 = vld [vmem:[%s2728_s1 + $0xc] sm:$0xf0] }
  0x12   :  { %v1598_v18 = vor.u32 %v1867_v14, %v1595_v15  ;;  %v1863_v20 = vld [vmem:[%s2728_s1 + $0x4] sm:$0xf]  ;;  %v1579_v21 = vld [vmem:[%s2728_s1 + $0x10] sm:$0xf0]  ;;  %v81_v23 = vld [vmem:[%s2727_s0 + $0x8] sm:$0xff]  ;;  %v1578_v29 = vor.u32 %v1865_v19, %v1577_v17  ;;  %vm210_vm0 = vcmask 523264  }
  0x13   :  { %v80_v22 = vld [vmem:[%s2727_s0] sm:$0xff]  ;;  %v1633_v25 = vld [vmem:[%s2728_s1 + $0x68] sm:$0xf]  ;;  %v1878_v26 = vld [vmem:[%s2728_s1 + $0x74] sm:$0xf0]  ;;  %v1582_v31 = vor.u32 %v1863_v20, %v1579_v21 }
  0x14   :  { %240 = vmatpush.bf16.msra.mxu0 %v1610_v10  ;;  %1928 = vmatpush.bf16.msra.mxu2 %v1610_v10  ;;  %v88_v24 = vld [vmem:[%s2727_s0 + $0x40] sm:$0xff]  ;;  %v1876_v27 = vld [vmem:[%s2728_s1 + $0x6c] sm:$0xf]  ;;  %v1635_v28 = vld [vmem:[%s2728_s1 + $0x78] sm:$0xf0]  ;;  %v1634_v32 = vor.u32 %v1878_v26, %v1633_v25  ;;  %v2350_v35 = vpack.c.bf16 %v81_v23, %v80_v22 }
  0x15   :  { %289 = vmatpush.bf16.msra.mxu1 %v1614_v11  ;;  %1932 = vmatpush.bf16.msra.mxu3 %v1614_v11  ;;  %v89_v30 = vld [vmem:[%s2727_s0 + $0x48] sm:$0xff]  ;;  %v1638_v33 = vor.u32 %v1876_v27, %v1635_v28  ;;  %v1874_v37 = vld [vmem:[%s2728_s1 + $0x54] sm:$0xf0]  ;;  %v1619_v39 = vld [vmem:[%s2728_s1 + $0x58] sm:$0xf0] }
  0x16   :  { %v1617_v34 = vld [vmem:[%s2728_s1 + $0x48] sm:$0xf]  ;;  %v2352_v36 = vpack.c.bf16 %v89_v30, %v88_v24  ;;  %v1872_v38 = vld [vmem:[%s2728_s1 + $0x4c] sm:$0xf]  ;;  %v1870_v43 = vld [vmem:[%s2728_s1 + $0x34] sm:$0xf0] }
  0x17   :  { %v1618_v40 = vor.u32 %v1874_v37, %v1617_v34  ;;  %v1622_v41 = vor.u32 %v1872_v38, %v1619_v39  ;;  %v1601_v42 = vld [vmem:[%s2728_s1 + $0x28] sm:$0xf]  ;;  %v1868_v44 = vld [vmem:[%s2728_s1 + $0x2c] sm:$0xf]  ;;  %v1603_v45 = vld [vmem:[%s2728_s1 + $0x38] sm:$0xf0] }
  0x18   :  { %241 = vmatpush.bf16.msra.mxu0 %v1594_v16  ;;  %1929 = vmatpush.bf16.msra.mxu2 %v1594_v16  ;;  %v1602_v46 = vor.u32 %v1870_v43, %v1601_v42  ;;  %v1606_v47 = vor.u32 %v1868_v44, %v1603_v45  ;;  %v82_v48 = vld [vmem:[%s2727_s0 + $0x10] sm:$0xff]  ;;  %v83_v49 = vld [vmem:[%s2727_s0 + $0x18] sm:$0xff]  ;;  %v1585_v54 = vld [vmem:[%s2728_s1 + $0x8] sm:$0xf] }
  0x19   :  { %290 = vmatpush.bf16.msra.mxu1 %v1598_v18  ;;  %1933 = vmatpush.bf16.msra.mxu3 %v1598_v18  ;;  %v90_v50 = vld [vmem:[%s2727_s0 + $0x50] sm:$0xff]  ;;  %v91_v51 = vld [vmem:[%s2727_s0 + $0x58] sm:$0xff]  ;;  %v97_v52 = vpack.c.bf16 %v83_v49, %v82_v48  ;;  %v1864_v56 = vld [vmem:[%s2728_s1 + $0xc] sm:$0xf] }
  0x1a   :  { %v2395_v53 = vpack.c.bf16 %v91_v51, %v90_v50  ;;  %v1866_v55 = vld [vmem:[%s2728_s1 + $0x14] sm:$0xf0]  ;;  %v1587_v58 = vld [vmem:[%s2728_s1 + $0x18] sm:$0xf0]  ;;  %v84_v60 = vld [vmem:[%s2727_s0 + $0x20] sm:$0xff] }
  0x1b   :  { %v1586_v57 = vor.u32 %v1866_v55, %v1585_v54  ;;  %v1590_v59 = vor.u32 %v1864_v56, %v1587_v58  ;;  %v85_v61 = vld [vmem:[%s2727_s0 + $0x28] sm:$0xff]  ;;  %v92_v62 = vld [vmem:[%s2727_s0 + $0x60] sm:$0xff]  ;;  %v86_v2 = vld [vmem:[%s2727_s0 + $0x30] sm:$0xff] }
  0x1c   :  { %242 = vmatpush.bf16.msra.mxu0 %v1578_v29  ;;  %1930 = vmatpush.bf16.msra.mxu2 %v1578_v29  ;;  %v93_v63 = vld [vmem:[%s2727_s0 + $0x68] sm:$0xff]  ;;  %v98_v0 = vpack.c.bf16 %v85_v61, %v84_v60  ;;  %v87_v3 = vld [vmem:[%s2727_s0 + $0x38] sm:$0xff]  ;;  %v94_v4 = vld [vmem:[%s2727_s0 + $0x70] sm:$0xff] }
  0x1d   :  { %291 = vmatpush.bf16.msra.mxu1 %v1582_v31  ;;  %1934 = vmatpush.bf16.msra.mxu3 %v1582_v31  ;;  %v2427_v1 = vpack.c.bf16 %v93_v63, %v92_v62  ;;  %v95_v5 = vld [vmem:[%s2727_s0 + $0x78] sm:$0xff]  ;;  %v99_v6 = vpack.c.bf16 %v87_v3, %v86_v2  ;;  %v1901_v10 = vld [vmem:[#allocation2 + $0xb0] sm:$0xff]  ;;  %v1884_v16 = vld [vmem:[#allocation2 + $0x28] sm:$0xff] }
  0x1e   :  { %v2447_v7 = vpack.c.bf16 %v95_v5, %v94_v4  ;;  %v1902_v8 = vld [vmem:[#allocation2 + $0xb8] sm:$0xff]  ;;  %v1909_v11 = vld [vmem:[#allocation2 + $0xf0] sm:$0xff]  ;;  %v1892_v17 = vld [vmem:[#allocation2 + $0x68] sm:$0xff] }
  0x1f   :  { %1639 = vmatmul.msk.bf16.vlgmr.msra.gmra.mxu0 %vm210_vm0, %v2350_v35  ;;  %1643 = vmatmul.msk.bf16.vlgmr.msra.gmra.mxu2 %vm210_vm0, %v2352_v36  ;;  %v1910_v9 = vld [vmem:[#allocation2 + $0xf8] sm:$0xff]  ;;  %v1885_v14 = vld [vmem:[#allocation2 + $0x30] sm:$0xff]  ;;  %v1883_v18 = vld [vmem:[#allocation2 + $0x20] sm:$0xff] }
  0x20   :  { %337 = vmatpush.bf16.msrb.mxu2 %v1634_v32  ;;  %1647 = vmatmul.msk.bf16.vlgmr.msra.gmra.mxu1 %vm210_vm0, %v2350_v35  ;;  %v1886_v12 = vld [vmem:[#allocation2 + $0x38] sm:$0xff]  ;;  %v1893_v15 = vld [vmem:[#allocation2 + $0x70] sm:$0xff]  ;;  %v1891_v19 = vld [vmem:[#allocation2 + $0x60] sm:$0xff] }
  0x21   :  { %386 = vmatpush.bf16.msrb.mxu3 %v1638_v33  ;;  %v1894_v13 = vld [vmem:[#allocation2 + $0x78] sm:$0xff]  ;;  %979 = vmatpush.bf16.msrb.mxu0 %v1886_v12  ;;  %v1881_v22 = vld [vmem:[#allocation2 + $0x10] sm:$0xff]  ;;  %v1900_v24 = vld [vmem:[#allocation2 + $0xa8] sm:$0xff] }
  0x22   :  { %1651 = vmatmul.msk.bf16.vlgmr.msra.gmra.mxu3 %vm210_vm0, %v2352_v36  ;;  %1028 = vmatpush.bf16.msrb.mxu1 %v1894_v13  ;;  %v1882_v20 = vld [vmem:[#allocation2 + $0x18] sm:$0xff]  ;;  %v1889_v23 = vld [vmem:[#allocation2 + $0x50] sm:$0xff]  ;;  %v1908_v25 = vld [vmem:[#allocation2 + $0xe8] sm:$0xff] }
  0x23   :  { %v1890_v21 = vld [vmem:[#allocation2 + $0x58] sm:$0xff]  ;;  %v1880_v26 = vld [vmem:[#allocation2 + $0x8] sm:$0xff]  ;;  %v1879_v28 = vld [vmem:[#allocation2] sm:$0xff] }
  0x24   :  { %338 = vmatpush.bf16.msrb.mxu2 %v1618_v40  ;;  %v1888_v27 = vld [vmem:[#allocation2 + $0x48] sm:$0xff]  ;;  %v1887_v29 = vld [vmem:[#allocation2 + $0x40] sm:$0xff]  ;;  %v1906_v56 = vld [vmem:[#allocation2 + $0xd8] sm:$0xff] }
  0x25   :  { %387 = vmatpush.bf16.msrb.mxu3 %v1622_v41  ;;  %980 = vmatpush.bf16.msrb.mxu0 %v1885_v14  ;;  %v2468_v30 = vld [vmem:[%s2729_s2] sm:$0xf] }
  0x26   :  { %1029 = vmatpush.bf16.msrb.mxu1 %v1893_v15  ;;  %v1899_v31 = vld [vmem:[#allocation2 + $0xa0] sm:$0xff]  ;;  %v2471_v33 = vperm.slane %v2468_v30, 1  ;;  %v2474_v34 = vperm.slane %v2468_v30, 0 }
  0x27   :  { %v1907_v32 = vld [vmem:[#allocation2 + $0xe0] sm:$0xff] }
  0x28   :  { %339 = vmatpush.bf16.msrb.mxu2 %v1602_v46 }
  0x29   :  { %388 = vmatpush.bf16.msrb.mxu3 %v1606_v47  ;;  %981 = vmatpush.bf16.msrb.mxu0 %v1884_v16 }
  0x2a   :  { %1030 = vmatpush.bf16.msrb.mxu1 %v1892_v17 }
  0x2c   :  { %340 = vmatpush.bf16.msrb.mxu2 %v1586_v57 }
  0x2d   :  { %389 = vmatpush.bf16.msrb.mxu3 %v1590_v59  ;;  %982 = vmatpush.bf16.msrb.mxu0 %v1883_v18 }
  0x2e   :  { %1031 = vmatpush.bf16.msrb.mxu1 %v1891_v19 }
  0x2f   :  { %1640 = vmatmul.msk.bf16.gmra.mxu0 %vm210_vm0, %v97_v52  ;;  %1644 = vmatmul.msk.bf16.gmra.mxu2 %vm210_vm0, %v2395_v53 }
  0x30   :  { %1648 = vmatmul.msk.bf16.gmra.mxu1 %vm210_vm0, %v97_v52  ;;  %1077 = vmatpush.bf16.msra.mxu2 %v1902_v8 }
  0x31   :  { %1126 = vmatpush.bf16.msra.mxu3 %v1910_v9  ;;  %983 = vmatpush.bf16.msrb.mxu0 %v1882_v20 }
  0x32   :  { %1652 = vmatmul.msk.bf16.gmra.mxu3 %vm210_vm0, %v2395_v53  ;;  %1032 = vmatpush.bf16.msrb.mxu1 %v1890_v21 }
  0x34   :  { %1078 = vmatpush.bf16.msra.mxu2 %v1901_v10 }
  0x35   :  { %1127 = vmatpush.bf16.msra.mxu3 %v1909_v11  ;;  %984 = vmatpush.bf16.msrb.mxu0 %v1881_v22 }
  0x36   :  { %1033 = vmatpush.bf16.msrb.mxu1 %v1889_v23 }
  0x38   :  { %1079 = vmatpush.bf16.msra.mxu2 %v1900_v24 }
  0x39   :  { %1128 = vmatpush.bf16.msra.mxu3 %v1908_v25  ;;  %985 = vmatpush.bf16.msrb.mxu0 %v1880_v26 }
  0x3a   :  { %1034 = vmatpush.bf16.msrb.mxu1 %v1888_v27 }
  0x3c   :  { %1080 = vmatpush.bf16.msra.mxu2 %v1899_v31 }
  0x3d   :  { %986 = vmatpush.bf16.msrb.mxu0 %v1879_v28  ;;  %1129 = vmatpush.bf16.msra.mxu3 %v1907_v32 }
  0x3e   :  { %1035 = vmatpush.bf16.msrb.mxu1 %v1887_v29 }
  0x3f   :  { %1641 = vmatmul.msk.bf16.gmra.mxu0 %vm210_vm0, %v98_v0  ;;  %1645 = vmatmul.msk.bf16.gmra.mxu2 %vm210_vm0, %v2427_v1 }
  0x40   :  { %1649 = vmatmul.msk.bf16.gmra.mxu1 %vm210_vm0, %v98_v0 }
  0x41   :  { %1130 = vmatpush.bf16.msra.mxu3 %v1906_v56 }
  0x42   :  { %1653 = vmatmul.msk.bf16.gmra.mxu3 %vm210_vm0, %v2427_v1 }
  0x4f   :  { %1642 = vmatmul.msk.bf16.gmra.mxu0 %vm210_vm0, %v99_v6  ;;  %1646 = vmatmul.msk.bf16.gmra.mxu2 %vm210_vm0, %v2447_v7 }
  0x50   :  { %1650 = vmatmul.msk.bf16.gmra.mxu1 %vm210_vm0, %v99_v6 }
  0x52   :  { %1654 = vmatmul.msk.bf16.gmra.mxu3 %vm210_vm0, %v2447_v7 }
  0x5f   :  { %1655 = vmatmul.msk.bf16.vlgmr.msrb.gmra.mxu2 %vm210_vm0, %v2350_v35 }
  0x62   :  { %1663 = vmatmul.msk.bf16.vlgmr.msrb.gmra.mxu3 %vm210_vm0, %v2350_v35 }
  0x6f   :  { %1656 = vmatmul.msk.bf16.gmra.mxu2 %vm210_vm0, %v97_v52 }
  0x72   :  { %1664 = vmatmul.msk.bf16.gmra.mxu3 %vm210_vm0, %v97_v52 }
  0x7f   :  { %1657 = vmatmul.msk.bf16.gmra.mxu2 %vm210_vm0, %v98_v0 }
  0x82   :  { %1665 = vmatmul.msk.bf16.gmra.mxu3 %vm210_vm0, %v98_v0 }
  0x8f   :  { %1658 = vmatmul.msk.bf16.gmra.mxu2 %vm210_vm0, %v99_v6 }
  0x92   :  { %1666 = vmatmul.msk.bf16.gmra.mxu3 %vm210_vm0, %v99_v6 }
  0x9c   :  { %v244_v35 = vpop.f32.mrf.mxu0 }
  0x9d   :  { %v245_v37 = vadd.f32 %v244_v35, %v2474_v34  ;;  %v293_v38 = vpop.f32.mrf.mxu1 }
  0x9e   :  { %v294_v39 = vadd.f32 %v293_v38, %v2471_v33 }
  0x9f   :  { %v431_v40 = vmul.f32 0.5, %v245_v37  ;;  %1659 = vmatmul.msk.bf16.gmra.mxu2 %vm210_vm0, %v2352_v36 }
  0xa0   :  { %v432_v41 = vmul.f32 0.5, %v294_v39 }
  0xa1   :  { %1943 = vtanh.f32 %v431_v40 }
  0xa2   :  { %1667 = vmatmul.msk.bf16.gmra.mxu3 %vm210_vm0, %v2352_v36  ;;  %v264_v42 = vpop.f32.mrf.mxu2  ;;  %1945 = vtanh.f32 %v432_v41  ;;  %v1898_v36 = vld [vmem:[#allocation2 + $0x98] sm:$0xff] }
  0xa3   :  { %v265_v43 = vadd.f32 %v264_v42, %v2474_v34  ;;  %1081 = vmatpush.bf16.msra.mxu2 %v1898_v36 }
  0xa4   :  { %v246_v46 = vpop.f32.mrf.mxu0 }
  0xa5   :  { %v313_v44 = vpop.f32.mrf.mxu3  ;;  %v247_v47 = vadd.f32 %v246_v46, %v2474_v34  ;;  %v295_v48 = vpop.f32.mrf.mxu1  ;;  %v463_v50 = vmul.f32 0.5, %v265_v43  ;;  %v1897_v46 = vld [vmem:[#allocation2 + $0x90] sm:$0xff] }
  0xa6   :  { %v314_v45 = vadd.f32 %v313_v44, %v2471_v33  ;;  %v296_v49 = vadd.f32 %v295_v48, %v2471_v33 }
  0xa7   :  { %v435_v51 = vmul.f32 0.5, %v247_v47  ;;  %v1944_v55 = vpop.eup %1943  ;;  %v1905_v47 = vld [vmem:[#allocation2 + $0xd0] sm:$0xff]  ;;  %1082 = vmatpush.bf16.msra.mxu2 %v1897_v46 }
  0xa8   :  { %v464_v52 = vmul.f32 0.5, %v314_v45  ;;  %v436_v54 = vmul.f32 0.5, %v296_v49  ;;  %v1946_v57 = vpop.eup %1945  ;;  %v559_v61 = vmul.f32 0.5, %v1944_v55  ;;  %1131 = vmatpush.bf16.msra.mxu3 %v1905_v47 }
  0xa9   :  { %1947 = vtanh.f32 %v435_v51  ;;  %v560_v0 = vmul.f32 0.5, %v1946_v57 }
  0xaa   :  { %1949 = vtanh.f32 %v436_v54  ;;  %v266_v58 = vpop.f32.mrf.mxu2  ;;  %v623_v11 = vadd.f32 0.5, %v559_v61 }
  0xab   :  { %1951 = vtanh.f32 %v463_v50  ;;  %v267_v59 = vadd.f32 %v266_v58, %v2474_v34  ;;  %v624_v15 = vadd.f32 0.5, %v560_v0 }
  0xac   :  { %1953 = vtanh.f32 %v464_v52  ;;  %v249_v63 = vpop.f32.mrf.mxu0 }
  0xad   :  { %v315_v60 = vpop.f32.mrf.mxu3  ;;  %v467_v2 = vmul.f32 0.5, %v267_v59  ;;  %v250_v3 = vadd.f32 %v249_v63, %v2474_v34  ;;  %v298_v4 = vpop.f32.mrf.mxu1 }
  0xae   :  { %v316_v62 = vadd.f32 %v315_v60, %v2471_v33  ;;  %v299_v6 = vadd.f32 %v298_v4, %v2471_v33 }
  0xaf   :  { %v1948_v8 = vpop.eup %1947  ;;  %1955 = vtanh.f32 %v467_v2  ;;  %v439_v9 = vmul.f32 0.5, %v250_v3  ;;  %1660 = vmatmul.msk.bf16.gmra.mxu2 %vm210_vm0, %v2395_v53 }
  0xb0   :  { %v468_v5 = vmul.f32 0.5, %v316_v62  ;;  %v1950_v10 = vpop.eup %1949  ;;  %v563_v12 = vmul.f32 0.5, %v1948_v8  ;;  %v440_v13 = vmul.f32 0.5, %v299_v6 }
  0xb1   :  { %v1952_v14 = vpop.eup %1951  ;;  %v564_v16 = vmul.f32 0.5, %v1950_v10  ;;  %v1904_v10 = vld [vmem:[#allocation2 + $0xc8] sm:$0xff] }
  0xb2   :  { %1957 = vtanh.f32 %v468_v5  ;;  %1668 = vmatmul.msk.bf16.gmra.mxu3 %vm210_vm0, %v2395_v53  ;;  %v1954_v17 = vpop.eup %1953  ;;  %v627_v18 = vadd.f32 0.5, %v563_v12  ;;  %v269_v19 = vpop.f32.mrf.mxu2  ;;  %v591_v23 = vmul.f32 0.5, %v1952_v14 }
  0xb3   :  { %v628_v20 = vadd.f32 0.5, %v564_v16  ;;  %1959 = vtanh.f32 %v439_v9  ;;  %v270_v21 = vadd.f32 %v269_v19, %v2474_v34  ;;  %v592_v28 = vmul.f32 0.5, %v1954_v17  ;;  %v1896_v9 = vld [vmem:[#allocation2 + $0x88] sm:$0xff]  ;;  %1132 = vmatpush.bf16.msra.mxu3 %v1904_v10 }
  0xb4   :  { %1961 = vtanh.f32 %v440_v13  ;;  %v251_v25 = vpop.f32.mrf.mxu0  ;;  %v687_v26 = vpack.c.bf16 %v627_v18, %v623_v11  ;;  %v2498_v43 = vadd.f32 0.5, %v591_v23  ;;  %1083 = vmatpush.bf16.msra.mxu2 %v1896_v9 }
  0xb5   :  { %v318_v22 = vpop.f32.mrf.mxu3  ;;  %v1956_v27 = vpop.eup %1955  ;;  %v252_v53 = vadd.f32 %v251_v25, %v2474_v34  ;;  %v688_v31 = vpack.c.bf16 %v628_v20, %v624_v15  ;;  %v471_v38 = vmul.f32 0.5, %v270_v21  ;;  %v2502_v48 = vadd.f32 0.5, %v592_v28 }
  0xb6   :  { %v319_v24 = vadd.f32 %v318_v22, %v2471_v33  ;;  %v300_v29 = vpop.f32.mrf.mxu1  ;;  %987 = vmatmul.bf16.vlgmr.msrb.gmra.mxu0 %v687_v26  ;;  %v595_v37 = vmul.f32 0.5, %v1956_v27 }
  0xb7   :  { %v301_v35 = vadd.f32 %v300_v29, %v2471_v33  ;;  %v443_v39 = vmul.f32 0.5, %v252_v53  ;;  %1036 = vmatmul.bf16.vlgmr.msrb.gmra.mxu1 %v688_v31 }
  0xb8   :  { %v1958_v32 = vpop.eup %1957  ;;  %v472_v41 = vmul.f32 0.5, %v319_v24  ;;  %v2500_v44 = vadd.f32 0.5, %v595_v37 }
  0xb9   :  { %v596_v40 = vmul.f32 0.5, %v1958_v32  ;;  %v444_v42 = vmul.f32 0.5, %v301_v35  ;;  %v1960_v45 = vpop.eup %1959  ;;  %1963 = vtanh.f32 %v443_v39 }
  0xba   :  { %v1962_v50 = vpop.eup %1961  ;;  %v271_v51 = vpop.f32.mrf.mxu2  ;;  %v703_v52 = vpack.c.bf16 %v2500_v44, %v2498_v43  ;;  %v567_v56 = vmul.f32 0.5, %v1960_v45 }
  0xbb   :  { %v2504_v49 = vadd.f32 0.5, %v596_v40  ;;  %1965 = vtanh.f32 %v444_v42  ;;  %v272_v54 = vadd.f32 %v271_v51, %v2474_v34  ;;  %v568_v59 = vmul.f32 0.5, %v1962_v50 }
  0xbc   :  { %1967 = vtanh.f32 %v471_v38  ;;  %v254_v58 = vpop.f32.mrf.mxu0  ;;  %v631_v8 = vadd.f32 0.5, %v567_v56 }
  0xbd   :  { %v320_v55 = vpop.f32.mrf.mxu3  ;;  %v704_v36 = vpack.c.bf16 %v2504_v49, %v2502_v48  ;;  %1969 = vtanh.f32 %v472_v41  ;;  %v475_v60 = vmul.f32 0.5, %v272_v54  ;;  %v255_v61 = vadd.f32 %v254_v58, %v2474_v34 }
  0xbe   :  { %v321_v57 = vadd.f32 %v320_v55, %v2471_v33  ;;  %v303_v62 = vpop.f32.mrf.mxu1  ;;  %v632_v13 = vadd.f32 0.5, %v568_v59 }
  0xbf   :  { %v304_v0 = vadd.f32 %v303_v62, %v2471_v33  ;;  %v1964_v2 = vpop.eup %1963  ;;  %1971 = vtanh.f32 %v475_v60  ;;  %v447_v3 = vmul.f32 0.5, %v255_v61  ;;  %1661 = vmatmul.msk.bf16.gmra.mxu2 %vm210_vm0, %v2427_v1 }
  0xc0   :  { %v476_v63 = vmul.f32 0.5, %v321_v57  ;;  %v571_v6 = vmul.f32 0.5, %v1964_v2 }
  0xc1   :  { %v1966_v4 = vpop.eup %1965  ;;  %v448_v5 = vmul.f32 0.5, %v304_v0 }
  0xc2   :  { %1973 = vtanh.f32 %v476_v63  ;;  %1669 = vmatmul.msk.bf16.gmra.mxu3 %vm210_vm0, %v2427_v1  ;;  %v1968_v11 = vpop.eup %1967  ;;  %v572_v12 = vmul.f32 0.5, %v1966_v4  ;;  %v274_v15 = vpop.f32.mrf.mxu2  ;;  %v635_v16 = vadd.f32 0.5, %v571_v6 }
  0xc3   :  { %v1970_v14 = vpop.eup %1969  ;;  %1975 = vtanh.f32 %v447_v3  ;;  %v275_v17 = vadd.f32 %v274_v15, %v2474_v34  ;;  %v599_v20 = vmul.f32 0.5, %v1968_v11 }
  0xc4   :  { %v636_v19 = vadd.f32 0.5, %v572_v12  ;;  %1977 = vtanh.f32 %v448_v5  ;;  %v256_v21 = vpop.f32.mrf.mxu0  ;;  %v691_v22 = vpack.c.bf16 %v635_v16, %v631_v8  ;;  %v600_v24 = vmul.f32 0.5, %v1970_v14 }
  0xc5   :  { %v323_v18 = vpop.f32.mrf.mxu3  ;;  %v1972_v23 = vpop.eup %1971  ;;  %v257_v25 = vadd.f32 %v256_v21, %v2474_v34  ;;  %v479_v31 = vmul.f32 0.5, %v275_v17  ;;  %v2522_v39 = vadd.f32 0.5, %v599_v20 }
  0xc6   :  { %v324_v1 = vadd.f32 %v323_v18, %v2471_v33  ;;  %v305_v26 = vpop.f32.mrf.mxu1  ;;  %v692_v27 = vpack.c.bf16 %v636_v19, %v632_v13  ;;  %992 = vmatmul.bf16.gmra.mxu0 %v691_v22  ;;  %v603_v29 = vmul.f32 0.5, %v1972_v23  ;;  %v2526_v42 = vadd.f32 0.5, %v600_v24 }
  0xc7   :  { %v306_v53 = vadd.f32 %v305_v26, %v2471_v33  ;;  %v451_v32 = vmul.f32 0.5, %v257_v25 }
  0xc8   :  { %v1974_v28 = vpop.eup %1973  ;;  %1041 = vmatmul.bf16.gmra.mxu1 %v692_v27  ;;  %v480_v37 = vmul.f32 0.5, %v324_v1  ;;  %v2524_v40 = vadd.f32 0.5, %v603_v29 }
  0xc9   :  { %v604_v35 = vmul.f32 0.5, %v1974_v28  ;;  %v452_v38 = vmul.f32 0.5, %v306_v53  ;;  %v1976_v41 = vpop.eup %1975  ;;  %1979 = vtanh.f32 %v451_v32 }
  0xca   :  { %v1978_v46 = vpop.eup %1977  ;;  %v276_v47 = vpop.f32.mrf.mxu2  ;;  %v707_v50 = vpack.c.bf16 %v2524_v40, %v2522_v39  ;;  %v575_v56 = vmul.f32 0.5, %v1976_v41 }
  0xcb   :  { %v2528_v45 = vadd.f32 0.5, %v604_v35  ;;  %1981 = vtanh.f32 %v452_v38  ;;  %v277_v51 = vadd.f32 %v276_v47, %v2474_v34  ;;  %v576_v59 = vmul.f32 0.5, %v1978_v46  ;;  %v1895_v35 = vld [vmem:[#allocation2 + $0x80] sm:$0xff] }
  0xcc   :  { %1983 = vtanh.f32 %v479_v31  ;;  %v259_v58 = vpop.f32.mrf.mxu0  ;;  %v639_v8 = vadd.f32 0.5, %v575_v56  ;;  %1084 = vmatpush.bf16.msra.mxu2 %v1895_v35 }
  0xcd   :  { %v325_v54 = vpop.f32.mrf.mxu3  ;;  %v708_v55 = vpack.c.bf16 %v2528_v45, %v2526_v42  ;;  %1985 = vtanh.f32 %v480_v37  ;;  %v483_v60 = vmul.f32 0.5, %v277_v51  ;;  %v260_v61 = vadd.f32 %v259_v58, %v2474_v34  ;;  %v1903_v37 = vld [vmem:[#allocation2 + $0xc0] sm:$0xff] }
  0xce   :  { %v326_v57 = vadd.f32 %v325_v54, %v2471_v33  ;;  %v308_v62 = vpop.f32.mrf.mxu1  ;;  %v640_v11 = vadd.f32 0.5, %v576_v59  ;;  %1133 = vmatpush.bf16.msra.mxu3 %v1903_v37 }
  0xcf   :  { %v309_v0 = vadd.f32 %v308_v62, %v2471_v33  ;;  %v1980_v2 = vpop.eup %1979  ;;  %1987 = vtanh.f32 %v483_v60  ;;  %v455_v3 = vmul.f32 0.5, %v260_v61  ;;  %1662 = vmatmul.msk.bf16.gmra.mxu2 %vm210_vm0, %v2447_v7 }
  0xd0   :  { %v484_v63 = vmul.f32 0.5, %v326_v57  ;;  %v579_v6 = vmul.f32 0.5, %v1980_v2 }
  0xd1   :  { %v1982_v4 = vpop.eup %1981  ;;  %v456_v5 = vmul.f32 0.5, %v309_v0 }
  0xd2   :  { %1989 = vtanh.f32 %v484_v63  ;;  %1670 = vmatmul.msk.bf16.gmra.mxu3 %vm210_vm0, %v2447_v7  ;;  %v1984_v9 = vpop.eup %1983  ;;  %v580_v10 = vmul.f32 0.5, %v1982_v4  ;;  %v279_v13 = vpop.f32.mrf.mxu2  ;;  %v643_v14 = vadd.f32 0.5, %v579_v6  ;;  %v2561_v4 = vperm.slane %v2468_v30, 2 }
  0xd3   :  { %v1986_v12 = vpop.eup %1985  ;;  %1991 = vtanh.f32 %v455_v3  ;;  %v280_v15 = vadd.f32 %v279_v13, %v2474_v34  ;;  %v607_v18 = vmul.f32 0.5, %v1984_v9 }
  0xd4   :  { %v644_v17 = vadd.f32 0.5, %v580_v10  ;;  %1993 = vtanh.f32 %v456_v5  ;;  %v261_v20 = vpop.f32.mrf.mxu0  ;;  %v695_v1 = vpack.c.bf16 %v643_v14, %v639_v8  ;;  %v608_v21 = vmul.f32 0.5, %v1986_v12 }
  0xd5   :  { %v328_v16 = vpop.f32.mrf.mxu3  ;;  %v1988_v7 = vpop.eup %1987  ;;  %v262_v22 = vadd.f32 %v261_v20, %v2474_v34  ;;  %v487_v28 = vmul.f32 0.5, %v280_v15  ;;  %v2546_v38 = vadd.f32 0.5, %v607_v18 }
  0xd6   :  { %v329_v19 = vadd.f32 %v328_v16, %v2471_v33  ;;  %v310_v23 = vpop.f32.mrf.mxu1  ;;  %v696_v24 = vpack.c.bf16 %v644_v17, %v640_v11  ;;  %997 = vmatmul.bf16.gmra.mxu0 %v695_v1  ;;  %v611_v27 = vmul.f32 0.5, %v1988_v7  ;;  %v2550_v47 = vadd.f32 0.5, %v608_v21 }
  0xd7   :  { %v311_v26 = vadd.f32 %v310_v23, %v2471_v33  ;;  %v459_v53 = vmul.f32 0.5, %v262_v22 }
  0xd8   :  { %v1990_v25 = vpop.eup %1989  ;;  %1046 = vmatmul.bf16.gmra.mxu1 %v696_v24  ;;  %v488_v31 = vmul.f32 0.5, %v329_v19  ;;  %v2548_v41 = vadd.f32 0.5, %v611_v27 }
  0xd9   :  { %v612_v29 = vmul.f32 0.5, %v1990_v25  ;;  %v460_v32 = vmul.f32 0.5, %v311_v26  ;;  %v1992_v46 = vpop.eup %1991  ;;  %1995 = vtanh.f32 %v459_v53 }
  0xda   :  { %v1994_v54 = vpop.eup %1993  ;;  %v281_v56 = vpop.f32.mrf.mxu2  ;;  %v711_v57 = vpack.c.bf16 %v2548_v41, %v2546_v38  ;;  %v583_v61 = vmul.f32 0.5, %v1992_v46 }
  0xdb   :  { %v2552_v51 = vadd.f32 0.5, %v612_v29  ;;  %1997 = vtanh.f32 %v460_v32  ;;  %v282_v58 = vadd.f32 %v281_v56, %v2474_v34  ;;  %v584_v63 = vmul.f32 0.5, %v1994_v54 }
  0xdc   :  { %1999 = vtanh.f32 %v487_v28  ;;  %v2564_v34 = vperm.slane %v2468_v30, 3  ;;  %v647_v8 = vadd.f32 0.5, %v583_v61 }
  0xdd   :  { %v330_v59 = vpop.f32.mrf.mxu3  ;;  %v712_v60 = vpack.c.bf16 %v2552_v51, %v2550_v47  ;;  %2001 = vtanh.f32 %v488_v31  ;;  %v491_v0 = vmul.f32 0.5, %v282_v58  ;;  %v648_v11 = vadd.f32 0.5, %v584_v63 }
  0xde   :  { %v331_v62 = vadd.f32 %v330_v59, %v2471_v33 }
  0xdf   :  { %v1996_v3 = vpop.eup %1995  ;;  %2003 = vtanh.f32 %v491_v0 }
  0xe0   :  { %v492_v2 = vmul.f32 0.5, %v331_v62  ;;  %v587_v6 = vmul.f32 0.5, %v1996_v3 }
  0xe1   :  { %v1998_v5 = vpop.eup %1997 }
  0xe2   :  { %2005 = vtanh.f32 %v492_v2  ;;  %v2000_v9 = vpop.eup %1999  ;;  %v588_v10 = vmul.f32 0.5, %v1998_v5  ;;  %v342_v33 = vpop.f32.mrf.mxu2  ;;  %v651_v13 = vadd.f32 0.5, %v587_v6 }
  0xe3   :  { %v2002_v12 = vpop.eup %2001  ;;  %v343_v14 = vadd.f32 %v342_v33, %v2561_v4  ;;  %v615_v17 = vmul.f32 0.5, %v2000_v9 }
  0xe4   :  { %v652_v16 = vadd.f32 0.5, %v588_v10  ;;  %v699_v19 = vpack.c.bf16 %v651_v13, %v647_v8  ;;  %v616_v1 = vmul.f32 0.5, %v2002_v12 }
  0xe5   :  { %v391_v15 = vpop.f32.mrf.mxu3  ;;  %v2004_v20 = vpop.eup %2003  ;;  %v433_v22 = vmul.f32 0.5, %v343_v14  ;;  %v2568_v25 = vadd.f32 0.5, %v615_v17 }
  0xe6   :  { %v392_v18 = vadd.f32 %v391_v15, %v2564_v34  ;;  %v700_v30 = vpack.c.bf16 %v652_v16, %v648_v11  ;;  %1002 = vmatmul.bf16.gmra.mxu0 %v699_v19  ;;  %v619_v21 = vmul.f32 0.5, %v2004_v20  ;;  %v2572_v27 = vadd.f32 0.5, %v616_v1 }
  0xe7   :  { %2007 = vtanh.f32 %v433_v22 }
  0xe8   :  { %v2006_v7 = vpop.eup %2005  ;;  %1051 = vmatmul.bf16.gmra.mxu1 %v700_v30  ;;  %v434_v24 = vmul.f32 0.5, %v392_v18  ;;  %v2570_v26 = vadd.f32 0.5, %v619_v21 }
  0xe9   :  { %v620_v23 = vmul.f32 0.5, %v2006_v7 }
  0xea   :  { %v344_v53 = vpop.f32.mrf.mxu2  ;;  %v715_v29 = vpack.c.bf16 %v2570_v26, %v2568_v25  ;;  %2009 = vtanh.f32 %v434_v24 }
  0xeb   :  { %v2574_v28 = vadd.f32 0.5, %v620_v23  ;;  %v345_v31 = vadd.f32 %v344_v53, %v2561_v4 }
  0xed   :  { %v393_v32 = vpop.f32.mrf.mxu3  ;;  %v716_v35 = vpack.c.bf16 %v2574_v28, %v2572_v27  ;;  %v437_v46 = vmul.f32 0.5, %v345_v31  ;;  %v2008_v56 = vpop.eup %2007 }
  0xee   :  { %v394_v37 = vadd.f32 %v393_v32, %v2564_v34  ;;  %v561_v63 = vmul.f32 0.5, %v2008_v56  ;;  %v1918_v56 = vld [vmem:[#allocation4 + $0x38] sm:$0xff] }
  0xef   :  { %2011 = vtanh.f32 %v437_v46  ;;  %1315 = vmatpush.bf16.msra.mxu0 %v1918_v56 }
  0xf0   :  { %v438_v54 = vmul.f32 0.5, %v394_v37  ;;  %v2010_v58 = vpop.eup %2009  ;;  %v625_v10 = vadd.f32 0.5, %v561_v63 }
  0xf1   :  { %v562_v3 = vmul.f32 0.5, %v2010_v58 }
  0xf2   :  { %2013 = vtanh.f32 %v438_v54  ;;  %v347_v59 = vpop.f32.mrf.mxu2 }
  0xf3   :  { %v348_v61 = vadd.f32 %v347_v59, %v2561_v4  ;;  %v626_v33 = vadd.f32 0.5, %v562_v3 }
  0xf5   :  { %v396_v62 = vpop.f32.mrf.mxu3  ;;  %v2012_v2 = vpop.eup %2011  ;;  %v441_v9 = vmul.f32 0.5, %v348_v61 }
  0xf6   :  { %v397_v0 = vadd.f32 %v396_v62, %v2564_v34  ;;  %v565_v6 = vmul.f32 0.5, %v2012_v2  ;;  %1007 = vmatmul.bf16.gmra.mxu0 %v703_v52 }
  0xf7   :  { %2015 = vtanh.f32 %v441_v9 }
  0xf8   :  { %v2014_v5 = vpop.eup %2013  ;;  %1056 = vmatmul.bf16.gmra.mxu1 %v704_v36  ;;  %v629_v11 = vadd.f32 0.5, %v565_v6  ;;  %v442_v12 = vmul.f32 0.5, %v397_v0 }
  0xf9   :  { %v566_v8 = vmul.f32 0.5, %v2014_v5 }
  0xfa   :  { %v689_v14 = vpack.c.bf16 %v629_v11, %v625_v10  ;;  %v349_v15 = vpop.f32.mrf.mxu2  ;;  %2017 = vtanh.f32 %v442_v12 }
  0xfb   :  { %v630_v13 = vadd.f32 0.5, %v566_v8  ;;  %v350_v17 = vadd.f32 %v349_v15, %v2561_v4 }
  0xfc   :  { %1085 = vmatmul.bf16.vlgmr.msra.gmra.mxu2 %v689_v14 }
  0xfd   :  { %v690_v16 = vpack.c.bf16 %v630_v13, %v626_v33  ;;  %v398_v18 = vpop.f32.mrf.mxu3  ;;  %v445_v44 = vmul.f32 0.5, %v350_v17  ;;  %v2016_v49 = vpop.eup %2015  ;;  %v1917_v17 = vld [vmem:[#allocation4 + $0x30] sm:$0xff] }
  0xfe   :  { %v399_v43 = vadd.f32 %v398_v18, %v2564_v34  ;;  %v569_v1 = vmul.f32 0.5, %v2016_v49  ;;  %1316 = vmatpush.bf16.msra.mxu0 %v1917_v17 }
  0xff   :  { %1134 = vmatmul.bf16.vlgmr.msra.gmra.mxu3 %v690_v16  ;;  %2019 = vtanh.f32 %v445_v44 }
 0x100   :  { %v446_v48 = vmul.f32 0.5, %v399_v43  ;;  %v2018_v52 = vpop.eup %2017  ;;  %v633_v31 = vadd.f32 0.5, %v569_v1 }
 0x101   :  { %v570_v21 = vmul.f32 0.5, %v2018_v52 }
 0x102   :  { %2021 = vtanh.f32 %v446_v48  ;;  %v352_v36 = vpop.f32.mrf.mxu2 }
 0x103   :  { %v353_v19 = vadd.f32 %v352_v36, %v2561_v4  ;;  %v634_v46 = vadd.f32 0.5, %v570_v21 }
 0x105   :  { %v401_v20 = vpop.f32.mrf.mxu3  ;;  %v2020_v7 = vpop.eup %2019  ;;  %v449_v53 = vmul.f32 0.5, %v353_v19 }
 0x106   :  { %v402_v30 = vadd.f32 %v401_v20, %v2564_v34  ;;  %v573_v23 = vmul.f32 0.5, %v2020_v7  ;;  %1012 = vmatmul.bf16.gmra.mxu0 %v707_v50 }
 0x107   :  { %2023 = vtanh.f32 %v449_v53 }
 0x108   :  { %v2022_v22 = vpop.eup %2021  ;;  %1061 = vmatmul.bf16.gmra.mxu1 %v708_v55  ;;  %v637_v32 = vadd.f32 0.5, %v573_v23  ;;  %v450_v37 = vmul.f32 0.5, %v402_v30 }
 0x109   :  { %v574_v24 = vmul.f32 0.5, %v2022_v22 }
 0x10a   :  { %v354_v58 = vpop.f32.mrf.mxu2  ;;  %v693_v59 = vpack.c.bf16 %v637_v32, %v633_v31  ;;  %2025 = vtanh.f32 %v450_v37 }
 0x10b   :  { %v638_v54 = vadd.f32 0.5, %v574_v24  ;;  %v355_v61 = vadd.f32 %v354_v58, %v2561_v4 }
 0x10c   :  { %1090 = vmatmul.bf16.gmra.mxu2 %v693_v59 }
 0x10d   :  { %v403_v62 = vpop.f32.mrf.mxu3  ;;  %v694_v39 = vpack.c.bf16 %v638_v54, %v634_v46  ;;  %v453_v42 = vmul.f32 0.5, %v355_v61  ;;  %v2024_v50 = vpop.eup %2023  ;;  %v1916_v46 = vld [vmem:[#allocation4 + $0x28] sm:$0xff] }
 0x10e   :  { %v404_v40 = vadd.f32 %v403_v62, %v2564_v34  ;;  %v577_v3 = vmul.f32 0.5, %v2024_v50  ;;  %1317 = vmatpush.bf16.msra.mxu0 %v1916_v46 }
 0x10f   :  { %1139 = vmatmul.bf16.gmra.mxu3 %v694_v39  ;;  %2027 = vtanh.f32 %v453_v42 }
 0x110   :  { %v454_v45 = vmul.f32 0.5, %v404_v40  ;;  %v2026_v55 = vpop.eup %2025  ;;  %v641_v33 = vadd.f32 0.5, %v577_v3 }
 0x111   :  { %v578_v8 = vmul.f32 0.5, %v2026_v55 }
 0x112   :  { %2029 = vtanh.f32 %v454_v45  ;;  %v357_v63 = vpop.f32.mrf.mxu2 }
 0x113   :  { %v358_v0 = vadd.f32 %v357_v63, %v2561_v4  ;;  %v642_v15 = vadd.f32 0.5, %v578_v8 }
 0x115   :  { %v406_v2 = vpop.f32.mrf.mxu3  ;;  %v2028_v6 = vpop.eup %2027  ;;  %v457_v12 = vmul.f32 0.5, %v358_v0 }
 0x116   :  { %v407_v5 = vadd.f32 %v406_v2, %v2564_v34  ;;  %v581_v10 = vmul.f32 0.5, %v2028_v6  ;;  %1017 = vmatmul.bf16.gmra.mxu0 %v711_v57 }
 0x117   :  { %2031 = vtanh.f32 %v457_v12 }
 0x118   :  { %v2030_v9 = vpop.eup %2029  ;;  %1066 = vmatmul.bf16.gmra.mxu1 %v712_v60  ;;  %v645_v13 = vadd.f32 0.5, %v581_v10  ;;  %v458_v14 = vmul.f32 0.5, %v407_v5  ;;  %v1915_v10 = vld [vmem:[#allocation4 + $0x20] sm:$0xff] }
 0x119   :  { %v582_v11 = vmul.f32 0.5, %v2030_v9  ;;  %1318 = vmatpush.bf16.msra.mxu0 %v1915_v10 }
 0x11a   :  { %v359_v18 = vpop.f32.mrf.mxu2  ;;  %v697_v43 = vpack.c.bf16 %v645_v13, %v641_v33  ;;  %2033 = vtanh.f32 %v458_v14 }
 0x11b   :  { %v646_v16 = vadd.f32 0.5, %v582_v11  ;;  %v360_v44 = vadd.f32 %v359_v18, %v2561_v4 }
 0x11c   :  { %1095 = vmatmul.bf16.gmra.mxu2 %v697_v43 }
 0x11d   :  { %v408_v48 = vpop.f32.mrf.mxu3  ;;  %v698_v38 = vpack.c.bf16 %v646_v16, %v642_v15  ;;  %v461_v47 = vmul.f32 0.5, %v360_v44  ;;  %v2032_v57 = vpop.eup %2031 }
 0x11e   :  { %v409_v41 = vadd.f32 %v408_v48, %v2564_v34  ;;  %v585_v19 = vmul.f32 0.5, %v2032_v57 }
 0x11f   :  { %1144 = vmatmul.bf16.gmra.mxu3 %v698_v38  ;;  %2035 = vtanh.f32 %v461_v47 }
 0x120   :  { %v462_v51 = vmul.f32 0.5, %v409_v41  ;;  %v2034_v60 = vpop.eup %2033  ;;  %v649_v24 = vadd.f32 0.5, %v585_v19 }
 0x121   :  { %v586_v30 = vmul.f32 0.5, %v2034_v60 }
 0x122   :  { %2037 = vtanh.f32 %v462_v51  ;;  %v362_v49 = vpop.f32.mrf.mxu2 }
 0x123   :  { %v363_v52 = vadd.f32 %v362_v49, %v2561_v4  ;;  %v650_v32 = vadd.f32 0.5, %v586_v30 }
 0x125   :  { %v411_v36 = vpop.f32.mrf.mxu3  ;;  %v2036_v1 = vpop.eup %2035  ;;  %v465_v23 = vmul.f32 0.5, %v363_v52 }
 0x126   :  { %v412_v20 = vadd.f32 %v411_v36, %v2564_v34  ;;  %v589_v21 = vmul.f32 0.5, %v2036_v1  ;;  %1022 = vmatmul.bf16.gmra.mxu0 %v715_v29 }
 0x127   :  { %2039 = vtanh.f32 %v465_v23 }
 0x128   :  { %v2038_v7 = vpop.eup %2037  ;;  %1071 = vmatmul.bf16.gmra.mxu1 %v716_v35  ;;  %v653_v53 = vadd.f32 0.5, %v589_v21  ;;  %v466_v31 = vmul.f32 0.5, %v412_v20  ;;  %v1914_v21 = vld [vmem:[#allocation4 + $0x18] sm:$0xff] }
 0x129   :  { %v590_v22 = vmul.f32 0.5, %v2038_v7  ;;  %1319 = vmatpush.bf16.msra.mxu0 %v1914_v21 }
 0x12a   :  { %v364_v54 = vpop.f32.mrf.mxu2  ;;  %v701_v56 = vpack.c.bf16 %v653_v53, %v649_v24  ;;  %2041 = vtanh.f32 %v466_v31 }
 0x12b   :  { %v654_v37 = vadd.f32 0.5, %v590_v22  ;;  %v365_v58 = vadd.f32 %v364_v54, %v2561_v4  ;;  %v1913_v54 = vld [vmem:[#allocation4 + $0x10] sm:$0xff] }
 0x12c   :  { %1100 = vmatmul.bf16.gmra.mxu2 %v701_v56 }
 0x12d   :  { %v413_v59 = vpop.f32.mrf.mxu3  ;;  %v702_v25 = vpack.c.bf16 %v654_v37, %v650_v32  ;;  %v469_v27 = vmul.f32 0.5, %v365_v58  ;;  %v2040_v29 = vpop.eup %2039  ;;  %1320 = vmatpush.bf16.msra.mxu0 %v1913_v54 }
 0x12e   :  { %v414_v26 = vadd.f32 %v413_v59, %v2564_v34  ;;  %v593_v40 = vmul.f32 0.5, %v2040_v29 }
 0x12f   :  { %1149 = vmatmul.bf16.gmra.mxu3 %v702_v25  ;;  %2043 = vtanh.f32 %v469_v27 }
 0x130   :  { %v470_v28 = vmul.f32 0.5, %v414_v26  ;;  %v2042_v35 = vpop.eup %2041  ;;  %v657_v3 = vadd.f32 0.5, %v593_v40 }
 0x131   :  { %v594_v50 = vmul.f32 0.5, %v2042_v35 }
 0x132   :  { %2045 = vtanh.f32 %v470_v28  ;;  %v367_v61 = vpop.f32.mrf.mxu2 }
 0x133   :  { %v368_v62 = vadd.f32 %v367_v61, %v2561_v4  ;;  %v658_v8 = vadd.f32 0.5, %v594_v50 }
 0x135   :  { %v416_v39 = vpop.f32.mrf.mxu3  ;;  %v2044_v45 = vpop.eup %2043  ;;  %v473_v2 = vmul.f32 0.5, %v368_v62 }
 0x136   :  { %v417_v42 = vadd.f32 %v416_v39, %v2564_v34  ;;  %v597_v63 = vmul.f32 0.5, %v2044_v45 }
 0x137   :  { %2047 = vtanh.f32 %v473_v2 }
 0x138   :  { %v2046_v55 = vpop.eup %2045  ;;  %v661_v5 = vadd.f32 0.5, %v597_v63  ;;  %v474_v6 = vmul.f32 0.5, %v417_v42 }
 0x139   :  { %v598_v0 = vmul.f32 0.5, %v2046_v55  ;;  %v988_v55 = vpop.f32.mrf.mxu0 }
 0x13a   :  { %v369_v11 = vpop.f32.mrf.mxu2  ;;  %v705_v12 = vpack.c.bf16 %v661_v5, %v657_v3  ;;  %2049 = vtanh.f32 %v474_v6 }
 0x13b   :  { %v662_v9 = vadd.f32 0.5, %v598_v0  ;;  %v370_v33 = vadd.f32 %v369_v11, %v2561_v4 }
 0x13c   :  { %1105 = vmatmul.bf16.gmra.mxu2 %v705_v12  ;;  %v1912_v12 = vld [vmem:[#allocation4 + $0x8] sm:$0xff] }
 0x13d   :  { %v418_v13 = vpop.f32.mrf.mxu3  ;;  %v706_v14 = vpack.c.bf16 %v662_v9, %v658_v8  ;;  %v477_v16 = vmul.f32 0.5, %v370_v33  ;;  %v2048_v18 = vpop.eup %2047  ;;  %1321 = vmatpush.bf16.msra.mxu0 %v1912_v12 }
 0x13e   :  { %v419_v15 = vadd.f32 %v418_v13, %v2564_v34  ;;  %v601_v41 = vmul.f32 0.5, %v2048_v18  ;;  %v1037_v33 = vpop.f32.mrf.mxu1 }
 0x13f   :  { %1154 = vmatmul.bf16.gmra.mxu3 %v706_v14  ;;  %2051 = vtanh.f32 %v477_v16 }
 0x140   :  { %v478_v17 = vmul.f32 0.5, %v419_v15  ;;  %v2050_v43 = vpop.eup %2049  ;;  %v665_v19 = vadd.f32 0.5, %v601_v41 }
 0x141   :  { %v602_v57 = vmul.f32 0.5, %v2050_v43  ;;  %v990_v15 = vpop.f32.mrf.mxu0 }
 0x142   :  { %2053 = vtanh.f32 %v478_v17  ;;  %v372_v44 = vpop.f32.mrf.mxu2 }
 0x143   :  { %v373_v48 = vadd.f32 %v372_v44, %v2561_v4  ;;  %v666_v30 = vadd.f32 0.5, %v602_v57 }
 0x145   :  { %v421_v38 = vpop.f32.mrf.mxu3  ;;  %v2052_v51 = vpop.eup %2051  ;;  %v481_v36 = vmul.f32 0.5, %v373_v48 }
 0x146   :  { %v422_v47 = vadd.f32 %v421_v38, %v2564_v34  ;;  %v605_v49 = vmul.f32 0.5, %v2052_v51  ;;  %v1039_v38 = vpop.f32.mrf.mxu1 }
 0x147   :  { %2055 = vtanh.f32 %v481_v36 }
 0x148   :  { %v2054_v60 = vpop.eup %2053  ;;  %v669_v20 = vadd.f32 0.5, %v605_v49  ;;  %v482_v1 = vmul.f32 0.5, %v422_v47 }
 0x149   :  { %v606_v52 = vmul.f32 0.5, %v2054_v60  ;;  %v993_v60 = vpop.f32.mrf.mxu0 }
 0x14a   :  { %v374_v22 = vpop.f32.mrf.mxu2  ;;  %v709_v23 = vpack.c.bf16 %v669_v20, %v665_v19  ;;  %2057 = vtanh.f32 %v482_v1  ;;  %v1911_v19 = vld [vmem:[#allocation4] sm:$0xff] }
 0x14b   :  { %v670_v7 = vadd.f32 0.5, %v606_v52  ;;  %v375_v24 = vadd.f32 %v374_v22, %v2561_v4  ;;  %v2637_v52 = vld [vmem:[%s2731_s4] ss:$0 sm:$0xff]  ;;  %1322 = vmatpush.bf16.msra.mxu0 %v1911_v19 }
 0x14c   :  { %1110 = vmatmul.bf16.gmra.mxu2 %v709_v23  ;;  %v989_v20 = vadd.f32 %v2637_v52, %v988_v55 }
 0x14d   :  { %v423_v53 = vpop.f32.mrf.mxu3  ;;  %v710_v31 = vpack.c.bf16 %v670_v7, %v666_v30  ;;  %v485_v37 = vmul.f32 0.5, %v375_v24  ;;  %v2056_v56 = vpop.eup %2055  ;;  %v991_v24 = vadd.f32 %v2637_v52, %v990_v15 }
 0x14e   :  { %v424_v32 = vadd.f32 %v423_v53, %v2564_v34  ;;  %v609_v27 = vmul.f32 0.5, %v2056_v56  ;;  %v1042_v49 = vpop.f32.mrf.mxu1  ;;  %v1038_v30 = vadd.f32 %v1037_v33, %v989_v20 }
 0x14f   :  { %1159 = vmatmul.bf16.gmra.mxu3 %v710_v31  ;;  %2059 = vtanh.f32 %v485_v37  ;;  %v1040_v31 = vadd.f32 %v1039_v38, %v991_v24 }
 0x150   :  { %v486_v46 = vmul.f32 0.5, %v424_v32  ;;  %v2058_v58 = vpop.eup %2057  ;;  %v673_v42 = vadd.f32 0.5, %v609_v27 }
 0x151   :  { %v610_v35 = vmul.f32 0.5, %v2058_v58  ;;  %v995_v36 = vpop.f32.mrf.mxu0  ;;  %v994_v58 = vadd.f32 %v2637_v52, %v993_v60 }
 0x152   :  { %2061 = vtanh.f32 %v486_v46  ;;  %v377_v59 = vpop.f32.mrf.mxu2 }
 0x153   :  { %v378_v25 = vadd.f32 %v377_v59, %v2561_v4  ;;  %v674_v63 = vadd.f32 0.5, %v610_v35  ;;  %v1043_v27 = vadd.f32 %v1042_v49, %v994_v58 }
 0x155   :  { %v426_v26 = vpop.f32.mrf.mxu3  ;;  %v2060_v29 = vpop.eup %2059  ;;  %v489_v40 = vmul.f32 0.5, %v378_v25 }
 0x156   :  { %v427_v28 = vadd.f32 %v426_v26, %v2564_v34  ;;  %v613_v62 = vmul.f32 0.5, %v2060_v29  ;;  %v1044_v1 = vpop.f32.mrf.mxu1 }
 0x157   :  { %2063 = vtanh.f32 %v489_v40 }
 0x158   :  { %v2062_v61 = vpop.eup %2061  ;;  %v677_v45 = vadd.f32 0.5, %v613_v62  ;;  %v490_v50 = vmul.f32 0.5, %v427_v28 }
 0x159   :  { %v614_v39 = vmul.f32 0.5, %v2062_v61  ;;  %v998_v23 = vpop.f32.mrf.mxu0 }
 0x15a   :  { %v379_v2 = vpop.f32.mrf.mxu2  ;;  %v713_v3 = vpack.c.bf16 %v677_v45, %v673_v42  ;;  %2065 = vtanh.f32 %v490_v50 }
 0x15b   :  { %v678_v0 = vadd.f32 0.5, %v614_v39  ;;  %v380_v5 = vadd.f32 %v379_v2, %v2561_v4  ;;  %v996_v39 = vadd.f32 %v2637_v52, %v995_v36 }
 0x15c   :  { %1115 = vmatmul.bf16.gmra.mxu2 %v713_v3 }
 0x15d   :  { %v428_v6 = vpop.f32.mrf.mxu3  ;;  %v714_v8 = vpack.c.bf16 %v678_v0, %v674_v63  ;;  %v493_v10 = vmul.f32 0.5, %v380_v5  ;;  %v2064_v13 = vpop.eup %2063  ;;  %v1045_v63 = vadd.f32 %v1044_v1, %v996_v39 }
 0x15e   :  { %v429_v9 = vadd.f32 %v428_v6, %v2564_v34  ;;  %v617_v16 = vmul.f32 0.5, %v2064_v13  ;;  %v1047_v37 = vpop.f32.mrf.mxu1 }
 0x15f   :  { %1164 = vmatmul.bf16.gmra.mxu3 %v714_v8  ;;  %2067 = vtanh.f32 %v493_v10  ;;  %v999_v10 = vadd.f32 %v2637_v52, %v998_v23 }
 0x160   :  { %v494_v11 = vmul.f32 0.5, %v429_v9  ;;  %v2066_v14 = vpop.eup %2065  ;;  %v681_v48 = vadd.f32 0.5, %v617_v16  ;;  %v1926_v16 = vld [vmem:[#allocation6 + $0x38] sm:$0xff] }
 0x161   :  { %v618_v4 = vmul.f32 0.5, %v2066_v14  ;;  %v1000_v25 = vpop.f32.mrf.mxu0  ;;  %v1048_v13 = vadd.f32 %v1047_v37, %v999_v10  ;;  %1504 = vmatpush.bf16.msra.mxu1 %v1926_v16 }
 0x162   :  { %2069 = vtanh.f32 %v494_v11 }
 0x163   :  { %v682_v41 = vadd.f32 0.5, %v618_v4 }
 0x165   :  { %v2068_v17 = vpop.eup %2067 }
 0x166   :  { %v621_v43 = vmul.f32 0.5, %v2068_v17  ;;  %v1049_v62 = vpop.f32.mrf.mxu1 }
 0x168   :  { %v2070_v18 = vpop.eup %2069  ;;  %v685_v34 = vadd.f32 0.5, %v621_v43  ;;  %v1001_v43 = vadd.f32 %v2637_v52, %v1000_v25 }
 0x169   :  { %v622_v44 = vmul.f32 0.5, %v2070_v18  ;;  %v1003_v50 = vpop.f32.mrf.mxu0 }
 0x16a   :  { %v717_v51 = vpack.c.bf16 %v685_v34, %v681_v48 }
 0x16b   :  { %v686_v47 = vadd.f32 0.5, %v622_v44 }
 0x16c   :  { %1120 = vmatmul.bf16.gmra.mxu2 %v717_v51 }
 0x16d   :  { %v718_v57 = vpack.c.bf16 %v686_v47, %v682_v41  ;;  %v1050_v47 = vadd.f32 %v1049_v62, %v1001_v43 }
 0x16e   :  { %v1052_v12 = vpop.f32.mrf.mxu1 }
 0x16f   :  { %1169 = vmatmul.bf16.gmra.mxu3 %v718_v57 }
 0x171   :  { %v1005_v14 = vpop.f32.mrf.mxu0 }
 0x176   :  { %v1054_v38 = vpop.f32.mrf.mxu1 }
 0x179   :  { %v1008_v20 = vpop.f32.mrf.mxu0 }
 0x17e   :  { %v1057_v23 = vpop.f32.mrf.mxu1 }
 0x17f   :  { %v1086_v7 = vpop.f32.mrf.mxu2 }
 0x180   :  { %v1087_v21 = vadd.f32 %v1086_v7, %v1038_v30  ;;  %v1004_v30 = vadd.f32 %v2637_v52, %v1003_v50 }
 0x182   :  { %v1135_v22 = vpop.f32.mrf.mxu3 }
 0x183   :  { %v1136_v53 = vadd.f32 %v1135_v22, %v1087_v21  ;;  %v1053_v22 = vadd.f32 %v1052_v12, %v1004_v30 }
 0x185   :  { %v1175_v32 = vmul.f32 0.5, %v1136_v53  ;;  %v1925_v53 = vld [vmem:[#allocation6 + $0x30] sm:$0xff] }
 0x186   :  { %1505 = vmatpush.bf16.msra.mxu1 %v1925_v53  ;;  %v1059_v39 = vpop.f32.mrf.mxu1 }
 0x187   :  { %v1088_v46 = vpop.f32.mrf.mxu2  ;;  %2071 = vtanh.f32 %v1175_v32 }
 0x188   :  { %v1089_v54 = vadd.f32 %v1088_v46, %v1040_v31  ;;  %v1006_v46 = vadd.f32 %v2637_v52, %v1005_v14 }
 0x18a   :  { %v1137_v56 = vpop.f32.mrf.mxu3 }
 0x18b   :  { %v1138_v59 = vadd.f32 %v1137_v56, %v1089_v54  ;;  %v1010_v56 = vpop.f32.mrf.mxu0 }
 0x18d   :  { %v1176_v26 = vmul.f32 0.5, %v1138_v59  ;;  %v2072_v29 = vpop.eup %2071 }
 0x18e   :  { %v1207_v42 = vmul.f32 0.5, %v2072_v29  ;;  %v1062_v10 = vpop.f32.mrf.mxu1 }
 0x18f   :  { %2073 = vtanh.f32 %v1176_v26  ;;  %v1091_v28 = vpop.f32.mrf.mxu2  ;;  %v1055_v26 = vadd.f32 %v1054_v38, %v1006_v46 }
 0x190   :  { %v1092_v35 = vadd.f32 %v1091_v28, %v1043_v27  ;;  %v1223_v2 = vadd.f32 0.5, %v1207_v42  ;;  %v1009_v42 = vadd.f32 %v2637_v52, %v1008_v20 }
 0x192   :  { %v1140_v61 = vpop.f32.mrf.mxu3 }
 0x193   :  { %v1141_v40 = vadd.f32 %v1140_v61, %v1092_v35 }
 0x195   :  { %v2074_v45 = vpop.eup %2073  ;;  %v1177_v0 = vmul.f32 0.5, %v1141_v40 }
 0x196   :  { %v1208_v55 = vmul.f32 0.5, %v2074_v45 }
 0x197   :  { %v1093_v5 = vpop.f32.mrf.mxu2  ;;  %2075 = vtanh.f32 %v1177_v0 }
 0x198   :  { %v1224_v3 = vadd.f32 0.5, %v1208_v55  ;;  %v1094_v6 = vadd.f32 %v1093_v5, %v1045_v63  ;;  %v1013_v55 = vpop.f32.mrf.mxu0  ;;  %v1058_v63 = vadd.f32 %v1057_v23, %v1009_v42 }
 0x19a   :  { %v1142_v8 = vpop.f32.mrf.mxu3  ;;  %v1239_v9 = vpack.c.bf16 %v1224_v3, %v1223_v2  ;;  %v1924_v2 = vld [vmem:[#allocation6 + $0x28] sm:$0xff] }
 0x19b   :  { %v1143_v11 = vadd.f32 %v1142_v8, %v1094_v6  ;;  %1506 = vmatpush.bf16.msra.mxu1 %v1924_v2  ;;  %v1011_v8 = vadd.f32 %v2637_v52, %v1010_v56 }
 0x19c   :  { %1323 = vmatmul.bf16.vlgmr.msra.gmra.mxu0 %v1239_v9 }
 0x19d   :  { %v1178_v33 = vmul.f32 0.5, %v1143_v11  ;;  %v2076_v17 = vpop.eup %2075 }
 0x19e   :  { %v1209_v48 = vmul.f32 0.5, %v2076_v17 }
 0x19f   :  { %2077 = vtanh.f32 %v1178_v33  ;;  %v1096_v15 = vpop.f32.mrf.mxu2 }
 0x1a0   :  { %v1097_v4 = vadd.f32 %v1096_v15, %v1048_v13  ;;  %v1225_v57 = vadd.f32 0.5, %v1209_v48  ;;  %v1060_v13 = vadd.f32 %v1059_v39, %v1011_v8  ;;  %v1015_v15 = vpop.f32.mrf.mxu0  ;;  %v1014_v48 = vadd.f32 %v2637_v52, %v1013_v55 }
 0x1a1   :  { %v1016_v20 = vadd.f32 %v2637_v52, %v1015_v15 }
 0x1a2   :  { %v1145_v18 = vpop.f32.mrf.mxu3 }
 0x1a3   :  { %v1146_v44 = vadd.f32 %v1145_v18, %v1097_v4 }
 0x1a5   :  { %v2078_v34 = vpop.eup %2077  ;;  %v1179_v51 = vmul.f32 0.5, %v1146_v44 }
 0x1a6   :  { %v1210_v41 = vmul.f32 0.5, %v2078_v34 }
 0x1a7   :  { %v1098_v49 = vpop.f32.mrf.mxu2  ;;  %2079 = vtanh.f32 %v1179_v51 }
 0x1a8   :  { %v1226_v60 = vadd.f32 0.5, %v1210_v41  ;;  %v1099_v36 = vadd.f32 %v1098_v49, %v1050_v47  ;;  %v1064_v41 = vpop.f32.mrf.mxu1  ;;  %v1063_v47 = vadd.f32 %v1062_v10, %v1014_v48 }
 0x1aa   :  { %v1147_v19 = vpop.f32.mrf.mxu3  ;;  %v1240_v1 = vpack.c.bf16 %v1226_v60, %v1225_v57  ;;  %v1923_v57 = vld [vmem:[#allocation6 + $0x20] sm:$0xff] }
 0x1ab   :  { %v1148_v7 = vadd.f32 %v1147_v19, %v1099_v36  ;;  %v1018_v19 = vpop.f32.mrf.mxu0  ;;  %1507 = vmatpush.bf16.msra.mxu1 %v1923_v57 }
 0x1ac   :  { %1328 = vmatmul.bf16.gmra.mxu0 %v1240_v1  ;;  %v1019_v56 = vadd.f32 %v2637_v52, %v1018_v19 }
 0x1ad   :  { %v1180_v21 = vmul.f32 0.5, %v1148_v7  ;;  %v2080_v31 = vpop.eup %2079 }
 0x1ae   :  { %v1211_v58 = vmul.f32 0.5, %v2080_v31 }
 0x1af   :  { %2081 = vtanh.f32 %v1180_v21  ;;  %v1101_v24 = vpop.f32.mrf.mxu2 }
 0x1b0   :  { %v1102_v32 = vadd.f32 %v1101_v24, %v1053_v22  ;;  %v1227_v28 = vadd.f32 0.5, %v1211_v58  ;;  %v1065_v22 = vadd.f32 %v1064_v41, %v1016_v20  ;;  %v1067_v24 = vpop.f32.mrf.mxu1 }
 0x1b2   :  { %v1150_v37 = vpop.f32.mrf.mxu3 }
 0x1b3   :  { %v1151_v54 = vadd.f32 %v1150_v37, %v1102_v32 }
 0x1b5   :  { %v2082_v59 = vpop.eup %2081  ;;  %v1181_v27 = vmul.f32 0.5, %v1151_v54 }
 0x1b6   :  { %v1212_v25 = vmul.f32 0.5, %v2082_v59  ;;  %v1020_v59 = vpop.f32.mrf.mxu0 }
 0x1b7   :  { %v1103_v35 = vpop.f32.mrf.mxu2  ;;  %2083 = vtanh.f32 %v1181_v27  ;;  %v1021_v39 = vadd.f32 %v2637_v52, %v1020_v59 }
 0x1b8   :  { %v1228_v29 = vadd.f32 0.5, %v1212_v25  ;;  %v1104_v61 = vadd.f32 %v1103_v35, %v1055_v26  ;;  %v1068_v26 = vadd.f32 %v1067_v24, %v1019_v56 }
 0x1ba   :  { %v1152_v62 = vpop.f32.mrf.mxu3  ;;  %v1241_v40 = vpack.c.bf16 %v1228_v29, %v1227_v28  ;;  %v1922_v28 = vld [vmem:[#allocation6 + $0x18] sm:$0xff] }
 0x1bb   :  { %v1153_v45 = vadd.f32 %v1152_v62, %v1104_v61  ;;  %v1069_v62 = vpop.f32.mrf.mxu1  ;;  %1508 = vmatpush.bf16.msra.mxu1 %v1922_v28 }
 0x1bc   :  { %1333 = vmatmul.bf16.gmra.mxu0 %v1241_v40 }
 0x1bd   :  { %v1182_v50 = vmul.f32 0.5, %v1153_v45  ;;  %v2084_v3 = vpop.eup %2083 }
 0x1be   :  { %v1213_v11 = vmul.f32 0.5, %v2084_v3 }
 0x1bf   :  { %2085 = vtanh.f32 %v1182_v50  ;;  %v1106_v0 = vpop.f32.mrf.mxu2  ;;  %v1023_v50 = vpop.f32.mrf.mxu0 }
 0x1c0   :  { %v1107_v5 = vadd.f32 %v1106_v0, %v1058_v63  ;;  %v1229_v16 = vadd.f32 0.5, %v1213_v11  ;;  %v1070_v63 = vadd.f32 %v1069_v62, %v1021_v39  ;;  %v1024_v11 = vadd.f32 %v2637_v52, %v1023_v50 }
 0x1c2   :  { %v1155_v6 = vpop.f32.mrf.mxu3 }
 0x1c3   :  { %v1156_v9 = vadd.f32 %v1155_v6, %v1107_v5  ;;  %v1921_v6 = vld [vmem:[#allocation6 + $0x10] sm:$0xff] }
 0x1c4   :  { %1509 = vmatpush.bf16.msra.mxu1 %v1921_v6 }
 0x1c5   :  { %v2086_v12 = vpop.eup %2085  ;;  %v1183_v14 = vmul.f32 0.5, %v1156_v9 }
 0x1c6   :  { %v1214_v33 = vmul.f32 0.5, %v2086_v12 }
 0x1c7   :  { %v1108_v4 = vpop.f32.mrf.mxu2  ;;  %2087 = vtanh.f32 %v1183_v14 }
 0x1c8   :  { %v1230_v17 = vadd.f32 0.5, %v1214_v33  ;;  %v1109_v18 = vadd.f32 %v1108_v4, %v1060_v13  ;;  %v1072_v33 = vpop.f32.mrf.mxu1  ;;  %v1920_v13 = vld [vmem:[#allocation6 + $0x8] sm:$0xff] }
 0x1c9   :  { %1510 = vmatpush.bf16.msra.mxu1 %v1920_v13  ;;  %v1073_v15 = vadd.f32 %v1072_v33, %v1024_v11 }
 0x1ca   :  { %v1157_v43 = vpop.f32.mrf.mxu3  ;;  %v1242_v44 = vpack.c.bf16 %v1230_v17, %v1229_v16  ;;  %v1025_v16 = vpop.f32.mrf.mxu0 }
 0x1cb   :  { %v1158_v34 = vadd.f32 %v1157_v43, %v1109_v18 }
 0x1cc   :  { %1338 = vmatmul.bf16.gmra.mxu0 %v1242_v44  ;;  %v1026_v44 = vadd.f32 %v2637_v52, %v1025_v16 }
 0x1cd   :  { %v1184_v38 = vmul.f32 0.5, %v1158_v34  ;;  %v2088_v60 = vpop.eup %2087 }
 0x1ce   :  { %v1215_v30 = vmul.f32 0.5, %v2088_v60 }
 0x1cf   :  { %2089 = vtanh.f32 %v1184_v38  ;;  %v1111_v51 = vpop.f32.mrf.mxu2 }
 0x1d0   :  { %v1112_v49 = vadd.f32 %v1111_v51, %v1063_v47  ;;  %v1231_v53 = vadd.f32 0.5, %v1215_v30  ;;  %v1074_v41 = vpop.f32.mrf.mxu1 }
 0x1d1   :  { %v1075_v51 = vadd.f32 %v1074_v41, %v1026_v44 }
 0x1d2   :  { %v1160_v36 = vpop.f32.mrf.mxu3 }
 0x1d3   :  { %v1161_v1 = vadd.f32 %v1160_v36, %v1112_v49 }
 0x1d5   :  { %v2090_v7 = vpop.eup %2089  ;;  %v1185_v23 = vmul.f32 0.5, %v1161_v1 }
 0x1d6   :  { %v1216_v21 = vmul.f32 0.5, %v2090_v7 }
 0x1d7   :  { %v1113_v32 = vpop.f32.mrf.mxu2  ;;  %2091 = vtanh.f32 %v1185_v23 }
 0x1d8   :  { %v1232_v31 = vadd.f32 0.5, %v1216_v21  ;;  %v1114_v37 = vadd.f32 %v1113_v32, %v1065_v22  ;;  %v1919_v32 = vld [vmem:[#allocation6] sm:$0xff] }
 0x1d9   :  { %1511 = vmatpush.bf16.msra.mxu1 %v1919_v32 }
 0x1da   :  { %v1162_v46 = vpop.f32.mrf.mxu3  ;;  %v1243_v54 = vpack.c.bf16 %v1232_v31, %v1231_v53 }
 0x1db   :  { %v1163_v58 = vadd.f32 %v1162_v46, %v1114_v37  ;;  %v2658_v37 = vld [vmem:[%s2733_s6] ss:$0 sm:$0xff] }
 0x1dc   :  { %1343 = vmatmul.bf16.gmra.mxu0 %v1243_v54 }
 0x1dd   :  { %v1186_v25 = vmul.f32 0.5, %v1163_v58  ;;  %v2092_v29 = vpop.eup %2091 }
 0x1de   :  { %v1217_v42 = vmul.f32 0.5, %v2092_v29 }
 0x1df   :  { %2093 = vtanh.f32 %v1186_v25  ;;  %v1116_v27 = vpop.f32.mrf.mxu2 }
 0x1e0   :  { %v1117_v35 = vadd.f32 %v1116_v27, %v1068_v26  ;;  %v1233_v2 = vadd.f32 0.5, %v1217_v42 }
 0x1e2   :  { %v1165_v61 = vpop.f32.mrf.mxu3 }
 0x1e3   :  { %v1166_v40 = vadd.f32 %v1165_v61, %v1117_v35 }
 0x1e5   :  { %v2094_v45 = vpop.eup %2093  ;;  %v1187_v0 = vmul.f32 0.5, %v1166_v40 }
 0x1e6   :  { %v1218_v55 = vmul.f32 0.5, %v2094_v45 }
 0x1e7   :  { %v1118_v5 = vpop.f32.mrf.mxu2  ;;  %2095 = vtanh.f32 %v1187_v0 }
 0x1e8   :  { %v1234_v3 = vadd.f32 0.5, %v1218_v55  ;;  %v1119_v8 = vadd.f32 %v1118_v5, %v1070_v63 }
 0x1ea   :  { %v1167_v9 = vpop.f32.mrf.mxu3  ;;  %v1244_v10 = vpack.c.bf16 %v1234_v3, %v1233_v2 }
 0x1eb   :  { %v1168_v12 = vadd.f32 %v1167_v9, %v1119_v8 }
 0x1ec   :  { %1348 = vmatmul.bf16.gmra.mxu0 %v1244_v10 }
 0x1ed   :  { %v1188_v14 = vmul.f32 0.5, %v1168_v12  ;;  %v2096_v4 = vpop.eup %2095 }
 0x1ee   :  { %v1219_v34 = vmul.f32 0.5, %v2096_v4 }
 0x1ef   :  { %2097 = vtanh.f32 %v1188_v14  ;;  %v1121_v17 = vpop.f32.mrf.mxu2 }
 0x1f0   :  { %v1122_v18 = vadd.f32 %v1121_v17, %v1073_v15  ;;  %v1235_v60 = vadd.f32 0.5, %v1219_v34 }
 0x1f2   :  { %v1170_v43 = vpop.f32.mrf.mxu3 }
 0x1f3   :  { %v1171_v48 = vadd.f32 %v1170_v43, %v1122_v18 }
 0x1f5   :  { %v2098_v38 = vpop.eup %2097  ;;  %v1189_v57 = vmul.f32 0.5, %v1171_v48 }
 0x1f6   :  { %v1220_v47 = vmul.f32 0.5, %v2098_v38 }
 0x1f7   :  { %v1123_v36 = vpop.f32.mrf.mxu2  ;;  %2099 = vtanh.f32 %v1189_v57 }
 0x1f8   :  { %v1236_v49 = vadd.f32 0.5, %v1220_v47  ;;  %v1124_v19 = vadd.f32 %v1123_v36, %v1075_v51 }
 0x1fa   :  { %v1172_v20 = vpop.f32.mrf.mxu3  ;;  %v1245_v1 = vpack.c.bf16 %v1236_v49, %v1235_v60 }
 0x1fb   :  { %v1173_v30 = vadd.f32 %v1172_v20, %v1124_v19 }
 0x1fc   :  { %1353 = vmatmul.bf16.gmra.mxu0 %v1245_v1 }
 0x1fd   :  { %v1190_v7 = vmul.f32 0.5, %v1173_v30  ;;  %v2100_v21 = vpop.eup %2099 }
 0x1fe   :  { %v1221_v52 = vmul.f32 0.5, %v2100_v21 }
 0x1ff   :  { %2101 = vtanh.f32 %v1190_v7 }
 0x200   :  { %v1237_v24 = vadd.f32 0.5, %v1221_v52 }
 0x205   :  { %v2102_v22 = vpop.eup %2101 }
 0x206   :  { %v1222_v23 = vmul.f32 0.5, %v2102_v22 }
 0x208   :  { %v1238_v53 = vadd.f32 0.5, %v1222_v23 }
 0x20a   :  { %v1246_v31 = vpack.c.bf16 %v1238_v53, %v1237_v24 }
 0x20c   :  { %1358 = vmatmul.bf16.gmra.mxu0 %v1246_v31 }
 0x219   :  { %v1324_v46 = vpop.f32.mrf.mxu0 }
 0x21a   :  { %v1325_v54 = vadd.f32 %v2658_v37, %v1324_v46 }
 0x21c   :  { %v1364_v56 = vmul.f32 0.5, %v1325_v54 }
 0x21e   :  { %2103 = vtanh.f32 %v1364_v56 }
 0x221   :  { %v1326_v58 = vpop.f32.mrf.mxu0 }
 0x222   :  { %v1327_v59 = vadd.f32 %v2658_v37, %v1326_v58 }
 0x224   :  { %v1365_v25 = vmul.f32 0.5, %v1327_v59  ;;  %v2104_v26 = vpop.eup %2103 }
 0x225   :  { %v1396_v29 = vmul.f32 0.5, %v2104_v26 }
 0x226   :  { %2105 = vtanh.f32 %v1365_v25 }
 0x227   :  { %v1412_v39 = vadd.f32 0.5, %v1396_v29 }
 0x229   :  { %v1329_v27 = vpop.f32.mrf.mxu0 }
 0x22a   :  { %v1330_v28 = vadd.f32 %v2658_v37, %v1329_v27 }
 0x22c   :  { %v2106_v35 = vpop.eup %2105  ;;  %v1366_v62 = vmul.f32 0.5, %v1330_v28 }
 0x22d   :  { %v1397_v61 = vmul.f32 0.5, %v2106_v35 }
 0x22e   :  { %2107 = vtanh.f32 %v1366_v62 }
 0x22f   :  { %v1413_v40 = vadd.f32 0.5, %v1397_v61 }
 0x231   :  { %v1428_v42 = vpack.c.bf16 %v1413_v40, %v1412_v39  ;;  %v1331_v45 = vpop.f32.mrf.mxu0 }
 0x232   :  { %v1332_v50 = vadd.f32 %v2658_v37, %v1331_v45 }
 0x233   :  { %1512 = vmatmul.bf16.vlgmr.msra.gmra.mxu1 %v1428_v42 }
 0x234   :  { %v1367_v55 = vmul.f32 0.5, %v1332_v50  ;;  %v2108_v63 = vpop.eup %2107 }
 0x235   :  { %v1398_v3 = vmul.f32 0.5, %v2108_v63 }
 0x236   :  { %2109 = vtanh.f32 %v1367_v55 }
 0x237   :  { %v1414_v9 = vadd.f32 0.5, %v1398_v3 }
 0x239   :  { %v1334_v0 = vpop.f32.mrf.mxu0 }
 0x23a   :  { %v1335_v2 = vadd.f32 %v2658_v37, %v1334_v0 }
 0x23c   :  { %v2110_v5 = vpop.eup %2109  ;;  %v1368_v8 = vmul.f32 0.5, %v1335_v2 }
 0x23d   :  { %v1399_v6 = vmul.f32 0.5, %v2110_v5 }
 0x23e   :  { %2111 = vtanh.f32 %v1368_v8 }
 0x23f   :  { %v1415_v10 = vadd.f32 0.5, %v1399_v6 }
 0x241   :  { %v1336_v11 = vpop.f32.mrf.mxu0  ;;  %v1429_v12 = vpack.c.bf16 %v1415_v10, %v1414_v9 }
 0x242   :  { %v1337_v33 = vadd.f32 %v2658_v37, %v1336_v11 }
 0x243   :  { %1517 = vmatmul.bf16.gmra.mxu1 %v1429_v12 }
 0x244   :  { %v1369_v13 = vmul.f32 0.5, %v1337_v33  ;;  %v2112_v14 = vpop.eup %2111 }
 0x245   :  { %v1400_v17 = vmul.f32 0.5, %v2112_v14 }
 0x246   :  { %2113 = vtanh.f32 %v1369_v13 }
 0x247   :  { %v1416_v44 = vadd.f32 0.5, %v1400_v17 }
 0x249   :  { %v1339_v15 = vpop.f32.mrf.mxu0 }
 0x24a   :  { %v1340_v16 = vadd.f32 %v2658_v37, %v1339_v15 }
 0x24c   :  { %v2114_v4 = vpop.eup %2113  ;;  %v1370_v43 = vmul.f32 0.5, %v1340_v16 }
 0x24d   :  { %v1401_v18 = vmul.f32 0.5, %v2114_v4 }
 0x24e   :  { %2115 = vtanh.f32 %v1370_v43 }
 0x24f   :  { %v1417_v48 = vadd.f32 0.5, %v1401_v18 }
 0x251   :  { %v1341_v34 = vpop.f32.mrf.mxu0  ;;  %v1430_v38 = vpack.c.bf16 %v1417_v48, %v1416_v44 }
 0x252   :  { %v1342_v41 = vadd.f32 %v2658_v37, %v1341_v34  ;;  %v1942_v34 = vld [vmem:[%s2735_s8] ss:$0 sm:$0xff] }
 0x253   :  { %1522 = vmatmul.bf16.gmra.mxu1 %v1430_v38 }
 0x254   :  { %v1371_v47 = vmul.f32 0.5, %v1342_v41  ;;  %v2116_v51 = vpop.eup %2115 }
 0x255   :  { %v1402_v49 = vmul.f32 0.5, %v2116_v51 }
 0x256   :  { %2117 = vtanh.f32 %v1371_v47 }
 0x257   :  { %v1418_v1 = vadd.f32 0.5, %v1402_v49 }
 0x259   :  { %v1344_v57 = vpop.f32.mrf.mxu0 }
 0x25a   :  { %v1345_v60 = vadd.f32 %v2658_v37, %v1344_v57 }
 0x25c   :  { %v2118_v36 = vpop.eup %2117  ;;  %v1372_v20 = vmul.f32 0.5, %v1345_v60 }
 0x25d   :  { %v1403_v19 = vmul.f32 0.5, %v2118_v36 }
 0x25e   :  { %2119 = vtanh.f32 %v1372_v20 }
 0x25f   :  { %v1419_v30 = vadd.f32 0.5, %v1403_v19 }
 0x261   :  { %v1346_v7 = vpop.f32.mrf.mxu0  ;;  %v1431_v21 = vpack.c.bf16 %v1419_v30, %v1418_v1 }
 0x262   :  { %v1347_v52 = vadd.f32 %v2658_v37, %v1346_v7 }
 0x263   :  { %1527 = vmatmul.bf16.gmra.mxu1 %v1431_v21 }
 0x264   :  { %v1373_v22 = vmul.f32 0.5, %v1347_v52  ;;  %v2120_v23 = vpop.eup %2119 }
 0x265   :  { %v1404_v31 = vmul.f32 0.5, %v2120_v23 }
 0x266   :  { %2121 = vtanh.f32 %v1373_v22 }
 0x267   :  { %v1420_v56 = vadd.f32 0.5, %v1404_v31 }
 0x269   :  { %v1349_v24 = vpop.f32.mrf.mxu0 }
 0x26a   :  { %v1350_v53 = vadd.f32 %v2658_v37, %v1349_v24 }
 0x26c   :  { %v2122_v32 = vpop.eup %2121  ;;  %v1374_v54 = vmul.f32 0.5, %v1350_v53 }
 0x26d   :  { %v1405_v46 = vmul.f32 0.5, %v2122_v32 }
 0x26e   :  { %2123 = vtanh.f32 %v1374_v54 }
 0x26f   :  { %v1421_v58 = vadd.f32 0.5, %v1405_v46 }
 0x271   :  { %v1351_v59 = vpop.f32.mrf.mxu0  ;;  %v1432_v25 = vpack.c.bf16 %v1421_v58, %v1420_v56 }
 0x272   :  { %v1352_v26 = vadd.f32 %v2658_v37, %v1351_v59 }
 0x273   :  { %1532 = vmatmul.bf16.gmra.mxu1 %v1432_v25 }
 0x274   :  { %v1375_v27 = vmul.f32 0.5, %v1352_v26  ;;  %v2124_v28 = vpop.eup %2123 }
 0x275   :  { %v1406_v61 = vmul.f32 0.5, %v2124_v28 }
 0x276   :  { %2125 = vtanh.f32 %v1375_v27 }
 0x277   :  { %v1422_v42 = vadd.f32 0.5, %v1406_v61 }
 0x279   :  { %v1354_v29 = vpop.f32.mrf.mxu0 }
 0x27a   :  { %v1355_v35 = vadd.f32 %v2658_v37, %v1354_v29 }
 0x27c   :  { %v2126_v62 = vpop.eup %2125  ;;  %v1376_v40 = vmul.f32 0.5, %v1355_v35 }
 0x27d   :  { %v1407_v39 = vmul.f32 0.5, %v2126_v62 }
 0x27e   :  { %2127 = vtanh.f32 %v1376_v40 }
 0x27f   :  { %v1423_v45 = vadd.f32 0.5, %v1407_v39 }
 0x281   :  { %v1356_v50 = vpop.f32.mrf.mxu0  ;;  %v1433_v55 = vpack.c.bf16 %v1423_v45, %v1422_v42 }
 0x282   :  { %v1357_v63 = vadd.f32 %v2658_v37, %v1356_v50 }
 0x283   :  { %1537 = vmatmul.bf16.gmra.mxu1 %v1433_v55 }
 0x284   :  { %v1377_v0 = vmul.f32 0.5, %v1357_v63  ;;  %v2128_v2 = vpop.eup %2127 }
 0x285   :  { %v1408_v6 = vmul.f32 0.5, %v2128_v2 }
 0x286   :  { %2129 = vtanh.f32 %v1377_v0 }
 0x287   :  { %v1424_v11 = vadd.f32 0.5, %v1408_v6 }
 0x289   :  { %v1359_v3 = vpop.f32.mrf.mxu0 }
 0x28a   :  { %v1360_v5 = vadd.f32 %v2658_v37, %v1359_v3 }
 0x28c   :  { %v2130_v8 = vpop.eup %2129  ;;  %v1378_v10 = vmul.f32 0.5, %v1360_v5 }
 0x28d   :  { %v1409_v9 = vmul.f32 0.5, %v2130_v8 }
 0x28e   :  { %2131 = vtanh.f32 %v1378_v10 }
 0x28f   :  { %v1425_v12 = vadd.f32 0.5, %v1409_v9 }
 0x291   :  { %v1361_v33 = vpop.f32.mrf.mxu0  ;;  %v1434_v13 = vpack.c.bf16 %v1425_v12, %v1424_v11 }
 0x292   :  { %v1362_v14 = vadd.f32 %v2658_v37, %v1361_v33 }
 0x293   :  { %1542 = vmatmul.bf16.gmra.mxu1 %v1434_v13 }
 0x294   :  { %v1379_v15 = vmul.f32 0.5, %v1362_v14  ;;  %v2132_v16 = vpop.eup %2131 }
 0x295   :  { %v1410_v17 = vmul.f32 0.5, %v2132_v16 }
 0x296   :  { %2133 = vtanh.f32 %v1379_v15 }
 0x297   :  { %v1426_v43 = vadd.f32 0.5, %v1410_v17 }
 0x29c   :  { %v2134_v4 = vpop.eup %2133 }
 0x29d   :  { %v1411_v18 = vmul.f32 0.5, %v2134_v4 }
 0x29f   :  { %v1427_v44 = vadd.f32 0.5, %v1411_v18 }
 0x2a1   :  { %v1435_v48 = vpack.c.bf16 %v1427_v44, %v1426_v43 }
 0x2a3   :  { %1547 = vmatmul.bf16.gmra.mxu1 %v1435_v48 }
 0x2b0   :  { %v1513_v38 = vpop.f32.mrf.mxu1 }
 0x2b1   :  { %v1514_v41 = vadd.f32 %v1942_v34, %v1513_v38 }
 0x2b3   :  { %1553 = vst [vmem:[%s2736_s9] sm:$0xff] %v1514_v41 }
 0x2b8   :  { %v1515_v37 = vpop.f32.mrf.mxu1 }
 0x2b9   :  { %v1516_v47 = vadd.f32 %v1942_v34, %v1515_v37 }
 0x2bb   :  { %1554 = vst [vmem:[%s2736_s9 + $0x8] sm:$0xff] %v1516_v47 }
 0x2c0   :  { %v1518_v51 = vpop.f32.mrf.mxu1 }
 0x2c1   :  { %v1519_v57 = vadd.f32 %v1942_v34, %v1518_v51 }
 0x2c3   :  { %1555 = vst [vmem:[%s2736_s9 + $0x10] sm:$0xff] %v1519_v57 }
 0x2c8   :  { %v1520_v60 = vpop.f32.mrf.mxu1 }
 0x2c9   :  { %v1521_v49 = vadd.f32 %v1942_v34, %v1520_v60 }
 0x2cb   :  { %1556 = vst [vmem:[%s2736_s9 + $0x18] sm:$0xff] %v1521_v49 }
 0x2d0   :  { %v1523_v36 = vpop.f32.mrf.mxu1 }
 0x2d1   :  { %v1524_v19 = vadd.f32 %v1942_v34, %v1523_v36 }
 0x2d3   :  { %1557 = vst [vmem:[%s2736_s9 + $0x20] sm:$0xff] %v1524_v19 }
 0x2d8   :  { %v1525_v20 = vpop.f32.mrf.mxu1 }
 0x2d9   :  { %v1526_v1 = vadd.f32 %v1942_v34, %v1525_v20 }
 0x2db   :  { %1558 = vst [vmem:[%s2736_s9 + $0x28] sm:$0xff] %v1526_v1 }
 0x2e0   :  { %v1528_v30 = vpop.f32.mrf.mxu1 }
 0x2e1   :  { %v1529_v7 = vadd.f32 %v1942_v34, %v1528_v30 }
 0x2e3   :  { %1559 = vst [vmem:[%s2736_s9 + $0x30] sm:$0xff] %v1529_v7 }
 0x2e8   :  { %v1530_v21 = vpop.f32.mrf.mxu1 }
 0x2e9   :  { %v1531_v52 = vadd.f32 %v1942_v34, %v1530_v21 }
 0x2eb   :  { %1560 = vst [vmem:[%s2736_s9 + $0x38] sm:$0xff] %v1531_v52 }
 0x2f0   :  { %v1533_v22 = vpop.f32.mrf.mxu1 }
 0x2f1   :  { %v1534_v23 = vadd.f32 %v1942_v34, %v1533_v22 }
 0x2f3   :  { %1561 = vst [vmem:[%s2736_s9 + $0x40] sm:$0xff] %v1534_v23 }
 0x2f8   :  { %v1535_v24 = vpop.f32.mrf.mxu1 }
 0x2f9   :  { %v1536_v53 = vadd.f32 %v1942_v34, %v1535_v24 }
 0x2fb   :  { %1562 = vst [vmem:[%s2736_s9 + $0x48] sm:$0xff] %v1536_v53 }
 0x300   :  { %v1538_v31 = vpop.f32.mrf.mxu1 }
 0x301   :  { %v1539_v32 = vadd.f32 %v1942_v34, %v1538_v31 }
 0x303   :  { %1563 = vst [vmem:[%s2736_s9 + $0x50] sm:$0xff] %v1539_v32 }
 0x308   :  { %v1540_v46 = vpop.f32.mrf.mxu1 }
 0x309   :  { %v1541_v54 = vadd.f32 %v1942_v34, %v1540_v46 }
 0x30b   :  { %1564 = vst [vmem:[%s2736_s9 + $0x58] sm:$0xff] %v1541_v54 }
 0x310   :  { %v1543_v56 = vpop.f32.mrf.mxu1 }
 0x311   :  { %v1544_v58 = vadd.f32 %v1942_v34, %v1543_v56 }
 0x313   :  { %1565 = vst [vmem:[%s2736_s9 + $0x60] sm:$0xff] %v1544_v58 }
 0x318   :  { %v1545_v59 = vpop.f32.mrf.mxu1 }
 0x319   :  { %v1546_v25 = vadd.f32 %v1942_v34, %v1545_v59 }
 0x31b   :  { %1566 = vst [vmem:[%s2736_s9 + $0x68] sm:$0xff] %v1546_v25 }
 0x320   :  { %v1548_v26 = vpop.f32.mrf.mxu1 }
 0x321   :  { %v1549_v27 = vadd.f32 %v1942_v34, %v1548_v26 }
 0x323   :  { %1567 = vst [vmem:[%s2736_s9 + $0x70] sm:$0xff] %v1549_v27 }
 0x328   :  { %v1550_v28 = vpop.f32.mrf.mxu1 }
 0x329   :  { %v1551_v29 = vadd.f32 %v1942_v34, %v1550_v28 }
 0x32b   :  { %1568 = vst [vmem:[%s2736_s9 + $0x78] sm:$0xff] %v1551_v29 }
 0x32c   :  { %1573 = vsyncpa [#allocation3], 1 }
 0x32d   :  { %1574 = vsyncpa [#allocation5], 1 }

</bundles_post_ra>
